<compile_context>
chip_gen: v5e
topology: v5e:2x2
jax: 0.10.0
libtpu: 0.0.40
codegen_flags: <defaults>
</compile_context>

<pallas_src>
import math

import jax
import jax.numpy as jnp
from jax.experimental import pallas as pl
from jax.experimental.pallas import tpu as pltpu  # noqa: F401  (kept for TPU backend)

# ------------------------- small synthetic ELECTRA config -------------------
B, S, H = 2, 8, 32          # batch, seq, hidden
NUM_HEADS = 2
HEAD_DIM = H // NUM_HEADS
INTER = 64                  # FFN intermediate size
NUM_LAYERS = 2
VOCAB = 128
MAX_POS = 64
TYPE_VOCAB = 2
LN_EPS = 1e-12

T = B * S                   # merged token axis
PAD = max(3 * H, INTER)     # lane width of the packed per-layer vector slab


# ------------------------------ kernel helpers -------------------------------
def _layer_norm(x, gamma, beta, eps=LN_EPS):
    mean = jnp.mean(x, axis=-1, keepdims=True)
    var = jnp.mean((x - mean) ** 2, axis=-1, keepdims=True)
    return (x - mean) * jax.lax.rsqrt(var + eps) * gamma + beta


def _gelu(x):
    # TODO(synk): HF ELECTRA "gelu" is erf-based; tanh approximation used here
    # so the transcendental stays on the EUP with guaranteed Mosaic lowering.
    c = math.sqrt(2.0 / math.pi)
    return 0.5 * x * (1.0 + jnp.tanh(c * (x + 0.044715 * x * x * x)))


# -------------------------------- fused kernel --------------------------------
def encoder_stack_kernel(x_ref, bias_ref, embln_ref,
                         wqkv_ref, wo_ref, w1_ref, w2_ref, slab_ref, out_ref):
    d = HEAD_DIM
    embln = embln_ref[...]                               # (2, H)
    x = _layer_norm(x_ref[...], embln[0:1], embln[1:2])  # (T, H) f32, VMEM-resident
    attn_bias = bias_ref[...]                            # (1, T, T): 0 keep / -1e9 pad+xbatch

    # Static unroll: fine at L=2.  TODO(synk): switch to lax.fori_loop or a
    # layer grid axis once NUM_LAYERS grows (bounds vreg live ranges).
    for li in range(NUM_LAYERS):
        wqkv = wqkv_ref[li]                              # (H, 3H)  bf16, group-major cols
        wo = wo_ref[li]                                  # (H, H)   bf16
        w1 = w1_ref[li]                                  # (H, INTER) bf16
        w2 = w2_ref[li]                                  # (INTER, H) bf16
        slab = slab_ref[li]                              # (8, PAD) f32 packed vectors

        bqkv = slab[0:1, 0:3 * H]                        # q part pre-scaled by 1/sqrt(d)
        b1 = slab[1:2, 0:INTER]
        bo = slab[2:3, 0:H]
        ln1g, ln1b = slab[3:4, 0:H], slab[4:5, 0:H]
        b2 = slab[5:6, 0:H]
        ln2g, ln2b = slab[6:7, 0:H], slab[7:8, 0:H]

        # one wide QKV projection over the merged batch (bf16 into MXU, f32 acc)
        qkv = jnp.dot(x.astype(jnp.bfloat16), wqkv,
                      preferred_element_type=jnp.float32) + bqkv          # (T, 3H)

        # per-head views on a leading batch axis; group-major [Q | K | V] cols
        q3 = jnp.stack([qkv[:, h * d:(h + 1) * d]
                        for h in range(NUM_HEADS)])                       # (NH, T, d)
        k3 = jnp.stack([qkv[:, H + h * d:H + (h + 1) * d]
                        for h in range(NUM_HEADS)])
        v3 = jnp.stack([qkv[:, 2 * H + h * d:2 * H + (h + 1) * d]
                        for h in range(NUM_HEADS)])

        # head-batched attention over the merged token axis; cross-batch and
        # padded keys are removed by the precomputed block-diagonal bias.
        s = jax.lax.dot_general(q3, k3, (((2,), (2,)), ((0,), (0,))),
                                preferred_element_type=jnp.float32)       # (NH, T, T)
        s = s + attn_bias
        s = s - jnp.max(s, axis=-1, keepdims=True)
        p = jnp.exp(s)
        p = p * pl.reciprocal(jnp.sum(p, axis=-1, keepdims=True), approx=True)

        ctx = jax.lax.dot_general(p, v3, (((2,), (1,)), ((0,), (0,))),
                                  preferred_element_type=jnp.float32)     # (NH, T, d)

        # single output projection: lane-concat heads back to (T, H), one matmul
        attn = jnp.concatenate([ctx[h] for h in range(NUM_HEADS)], axis=1)  # (T, H)
        attn_out = jnp.dot(attn.astype(jnp.bfloat16), wo,
                           preferred_element_type=jnp.float32) + bo
        h1 = _layer_norm(x + attn_out, ln1g, ln1b)

        # feed-forward
        inter = _gelu(jnp.dot(h1.astype(jnp.bfloat16), w1,
                              preferred_element_type=jnp.float32) + b1)
        ffn = jnp.dot(inter.astype(jnp.bfloat16), w2,
                      preferred_element_type=jnp.float32) + b2
        x = _layer_norm(h1 + ffn, ln2g, ln2b)

    # CLS-token pooling for every batch row, one coalesced (B, H) store
    out_ref[...] = jnp.concatenate([x[b * S:b * S + 1, :] for b in range(B)],
                                   axis=0)


# ------------------------------- wrapper ---------------------------------------
def encoder_forward_fused(emb_flat, attn_bias, packed):
    # Single invocation, no grid: every operand is a whole-array VMEM block,
    # loaded exactly once; all layers run with VMEM-resident activations.
    return pl.pallas_call(
        encoder_stack_kernel,
        out_shape=jax.ShapeDtypeStruct((B, H), jnp.float32),
    )(emb_flat, attn_bias, packed["emb_ln"], packed["wqkv"], packed["wo"],
      packed["w1"], packed["w2"], packed["slab"])


# ---------------------------- parameter init / packing -------------------------
def init_params(key):
    def dense(k, fi, fo):
        return jax.random.normal(k, (fi, fo), jnp.float32) * 0.02

    keys = jax.random.split(key, 3 + NUM_LAYERS)
    params = {
        "word_emb": jax.random.normal(keys[0], (VOCAB, H), jnp.float32) * 0.02,
        "pos_emb": jax.random.normal(keys[1], (MAX_POS, H), jnp.float32) * 0.02,
        "type_emb": jax.random.normal(keys[2], (TYPE_VOCAB, H), jnp.float32) * 0.02,
        "emb_ln_g": jnp.ones((1, H), jnp.float32),
        "emb_ln_b": jnp.zeros((1, H), jnp.float32),
        "layers": [],
    }
    for li in range(NUM_LAYERS):
        lk = jax.random.split(keys[3 + li], 6)
        params["layers"].append({
            "wq": dense(lk[0], H, H), "bq": jnp.zeros((1, H), jnp.float32),
            "wk": dense(lk[1], H, H), "bk": jnp.zeros((1, H), jnp.float32),
            "wv": dense(lk[2], H, H), "bv": jnp.zeros((1, H), jnp.float32),
            "wo": dense(lk[3], H, H), "bo": jnp.zeros((1, H), jnp.float32),
            "ln1_g": jnp.ones((1, H), jnp.float32),
            "ln1_b": jnp.zeros((1, H), jnp.float32),
            "w1": dense(lk[4], H, INTER), "b1": jnp.zeros((1, INTER), jnp.float32),
            "w2": dense(lk[5], INTER, H), "b2": jnp.zeros((1, H), jnp.float32),
            "ln2_g": jnp.ones((1, H), jnp.float32),
            "ln2_b": jnp.zeros((1, H), jnp.float32),
        })
    return params


def pack_params(params):
    """Stack per-layer weights (group-major QKV columns), fold the attention
    scale into Q, pack every small per-layer vector into one (L, 8, PAD) slab,
    and cast matmul weights to bf16 (vectors stay f32)."""
    layers = params["layers"]
    scale = 1.0 / math.sqrt(HEAD_DIM)

    def padv(v):   # (1, n) -> (1, PAD)
        return jnp.pad(v, ((0, 0), (0, PAD - v.shape[1])))

    wqkv_l, wo_l, w1_l, w2_l, slab_l = [], [], [], [], []
    for lp in layers:
        # group-major: [ Wq (all heads, pre-scaled) | Wk | Wv ]
        wqkv_l.append(jnp.concatenate([lp["wq"] * scale, lp["wk"], lp["wv"]], axis=1))
        wo_l.append(lp["wo"])
        w1_l.append(lp["w1"])
        w2_l.append(lp["w2"])
        bqkv = jnp.concatenate([lp["bq"] * scale, lp["bk"], lp["bv"]], axis=1)
        slab_l.append(jnp.concatenate(
            [padv(bqkv), padv(lp["b1"]), padv(lp["bo"]),
             padv(lp["ln1_g"]), padv(lp["ln1_b"]),
             padv(lp["b2"]), padv(lp["ln2_g"]), padv(lp["ln2_b"])], axis=0))

    return {
        "wqkv": jnp.stack(wqkv_l).astype(jnp.bfloat16),                    # (L, H, 3H)
        "wo": jnp.stack(wo_l).astype(jnp.bfloat16),                        # (L, H, H)
        "w1": jnp.stack(w1_l).astype(jnp.bfloat16),                        # (L, H, INTER)
        "w2": jnp.stack(w2_l).astype(jnp.bfloat16),                        # (L, INTER, H)
        "slab": jnp.stack(slab_l),                                         # (L, 8, PAD) f32
        "emb_ln": jnp.concatenate([params["emb_ln_g"], params["emb_ln_b"]],
                                  axis=0),                                 # (2, H)
    }


# ------------------------------- forward ---------------------------------------
def query_encoder_forward(params, packed, input_ids, attention_mask):
    # Embedding gather (glue) — word + position + token-type (all zeros).
    pos_ids = jnp.arange(S, dtype=jnp.int32)
    type_ids = jnp.zeros((B, S), dtype=jnp.int32)
    emb = (params["word_emb"][input_ids]
           + params["pos_emb"][pos_ids][None, :, :]
           + params["type_emb"][type_ids])
    emb_flat = emb.reshape(T, H)                                           # merged batch

    # Block-diagonal additive attention bias for the merged token axis:
    # 0 for (same batch element AND key unpadded), -1e9 otherwise.
    mask_flat = attention_mask.reshape(T)
    batch_ids = jnp.arange(T, dtype=jnp.int32) // S
    keep = (batch_ids[:, None] == batch_ids[None, :]) & (mask_flat[None, :] > 0)
    attn_bias = jnp.where(keep, 0.0, -1e9).astype(jnp.float32)[None, :, :]  # (1, T, T)

    return encoder_forward_fused(emb_flat, attn_bias, packed)


# --------------------------------- main ----------------------------------------
if __name__ == "__main__":
    key = jax.random.PRNGKey(0)
    pkey, ikey = jax.random.split(key)
    params = init_params(pkey)
    packed = pack_params(params)

    input_ids = jax.random.randint(ikey, (B, S), 0, VOCAB, dtype=jnp.int32)
    attention_mask = jnp.array([[1, 1, 1, 1, 1, 1, 1, 1],
                                [1, 1, 1, 1, 1, 1, 0, 0]], dtype=jnp.int32)

    fwd = jax.jit(query_encoder_forward)
    cls_out = fwd(params, packed, input_ids, attention_mask)
    cls_out = jax.block_until_ready(cls_out)
    assert cls_out.shape == (B, H) and cls_out.dtype == jnp.float32
    print("KERNEL_OK")
</pallas_src>

<mosaic_0001>
module attributes {stable_mosaic.version = 11 : i64} {
  func.func @encoder_stack_kernel(%arg0: memref<16x32xf32, #tpu.memory_space<vmem>>, %arg1: memref<1x16x16xf32, #tpu.memory_space<vmem>>, %arg2: memref<2x32xf32, #tpu.memory_space<vmem>>, %arg3: memref<2x32x96xbf16, #tpu.memory_space<vmem>>, %arg4: memref<2x32x32xbf16, #tpu.memory_space<vmem>>, %arg5: memref<2x32x64xbf16, #tpu.memory_space<vmem>>, %arg6: memref<2x64x32xbf16, #tpu.memory_space<vmem>>, %arg7: memref<2x8x96xf32, #tpu.memory_space<vmem>>, %arg8: memref<2x32xf32, #tpu.memory_space<vmem>>) attributes {dimension_semantics = [], scalar_prefetch = 0 : i64, scratch_operands = 0 : i64, tpu.core_type = #tpu.core_type<tc>} {
    %c0 = arith.constant 0 : index
    %c0_0 = arith.constant 0 : index
    %0 = vector.load %arg2[%c0, %c0_0] : memref<2x32xf32, #tpu.memory_space<vmem>>, vector<2x32xf32>
    %c0_1 = arith.constant 0 : index
    %c0_2 = arith.constant 0 : index
    %1 = vector.load %arg0[%c0_1, %c0_2] : memref<16x32xf32, #tpu.memory_space<vmem>>, vector<16x32xf32>
    %2 = vector.extract_strided_slice %0 {offsets = [0, 0], sizes = [1, 32], strides = [1, 1]} : vector<2x32xf32> to vector<1x32xf32>
    %3 = vector.extract_strided_slice %0 {offsets = [1, 0], sizes = [1, 32], strides = [1, 1]} : vector<2x32xf32> to vector<1x32xf32>
    %cst = arith.constant dense<0.000000e+00> : vector<16xf32>
    %4 = vector.multi_reduction <add>, %1, %cst [1] : vector<16x32xf32> to vector<16xf32>
    %5 = vector.shape_cast %4 : vector<16xf32> to vector<16x1xf32>
    %cst_3 = arith.constant 3.200000e+01 : f32
    %6 = vector.broadcast %cst_3 : f32 to vector<16x1xf32>
    %7 = arith.divf %5, %6 : vector<16x1xf32>
    %8 = vector.broadcast %7 : vector<16x1xf32> to vector<16x32xf32>
    %9 = arith.subf %1, %8 : vector<16x32xf32>
    %10 = arith.mulf %9, %9 : vector<16x32xf32>
    %cst_4 = arith.constant dense<0.000000e+00> : vector<16xf32>
    %11 = vector.multi_reduction <add>, %10, %cst_4 [1] : vector<16x32xf32> to vector<16xf32>
    %12 = vector.shape_cast %11 : vector<16xf32> to vector<16x1xf32>
    %cst_5 = arith.constant 3.200000e+01 : f32
    %13 = vector.broadcast %cst_5 : f32 to vector<16x1xf32>
    %14 = arith.divf %12, %13 : vector<16x1xf32>
    %15 = vector.broadcast %7 : vector<16x1xf32> to vector<16x32xf32>
    %16 = arith.subf %1, %15 : vector<16x32xf32>
    %cst_6 = arith.constant 9.99999996E-13 : f32
    %17 = vector.broadcast %cst_6 : f32 to vector<16x1xf32>
    %18 = arith.addf %14, %17 : vector<16x1xf32>
    %19 = math.rsqrt %18 : vector<16x1xf32>
    %20 = vector.broadcast %19 : vector<16x1xf32> to vector<16x32xf32>
    %21 = arith.mulf %16, %20 : vector<16x32xf32>
    %22 = vector.broadcast %2 : vector<1x32xf32> to vector<16x32xf32>
    %23 = arith.mulf %21, %22 : vector<16x32xf32>
    %24 = vector.broadcast %3 : vector<1x32xf32> to vector<16x32xf32>
    %25 = arith.addf %23, %24 : vector<16x32xf32>
    %c0_7 = arith.constant 0 : index
    %c0_8 = arith.constant 0 : index
    %c0_9 = arith.constant 0 : index
    %26 = vector.load %arg1[%c0_7, %c0_8, %c0_9] : memref<1x16x16xf32, #tpu.memory_space<vmem>>, vector<1x16x16xf32>
    %c0_10 = arith.constant 0 : index
    %c0_11 = arith.constant 0 : index
    %c0_12 = arith.constant 0 : index
    %27 = vector.load %arg3[%c0_10, %c0_11, %c0_12] : memref<2x32x96xbf16, #tpu.memory_space<vmem>>, vector<1x32x96xbf16>
    %28 = vector.shape_cast %27 : vector<1x32x96xbf16> to vector<32x96xbf16>
    %c0_13 = arith.constant 0 : index
    %c0_14 = arith.constant 0 : index
    %c0_15 = arith.constant 0 : index
    %29 = vector.load %arg4[%c0_13, %c0_14, %c0_15] : memref<2x32x32xbf16, #tpu.memory_space<vmem>>, vector<1x32x32xbf16>
    %30 = vector.shape_cast %29 : vector<1x32x32xbf16> to vector<32x32xbf16>
    %c0_16 = arith.constant 0 : index
    %c0_17 = arith.constant 0 : index
    %c0_18 = arith.constant 0 : index
    %31 = vector.load %arg5[%c0_16, %c0_17, %c0_18] : memref<2x32x64xbf16, #tpu.memory_space<vmem>>, vector<1x32x64xbf16>
    %32 = vector.shape_cast %31 : vector<1x32x64xbf16> to vector<32x64xbf16>
    %c0_19 = arith.constant 0 : index
    %c0_20 = arith.constant 0 : index
    %c0_21 = arith.constant 0 : index
    %33 = vector.load %arg6[%c0_19, %c0_20, %c0_21] : memref<2x64x32xbf16, #tpu.memory_space<vmem>>, vector<1x64x32xbf16>
    %34 = vector.shape_cast %33 : vector<1x64x32xbf16> to vector<64x32xbf16>
    %c0_22 = arith.constant 0 : index
    %c0_23 = arith.constant 0 : index
    %c0_24 = arith.constant 0 : index
    %35 = vector.load %arg7[%c0_22, %c0_23, %c0_24] : memref<2x8x96xf32, #tpu.memory_space<vmem>>, vector<1x8x96xf32>
    %36 = vector.shape_cast %35 : vector<1x8x96xf32> to vector<8x96xf32>
    %37 = vector.extract_strided_slice %36 {offsets = [0, 0], sizes = [1, 96], strides = [1, 1]} : vector<8x96xf32> to vector<1x96xf32>
    %38 = vector.extract_strided_slice %36 {offsets = [1, 0], sizes = [1, 64], strides = [1, 1]} : vector<8x96xf32> to vector<1x64xf32>
    %39 = vector.extract_strided_slice %36 {offsets = [2, 0], sizes = [1, 32], strides = [1, 1]} : vector<8x96xf32> to vector<1x32xf32>
    %40 = vector.extract_strided_slice %36 {offsets = [3, 0], sizes = [1, 32], strides = [1, 1]} : vector<8x96xf32> to vector<1x32xf32>
    %41 = vector.extract_strided_slice %36 {offsets = [4, 0], sizes = [1, 32], strides = [1, 1]} : vector<8x96xf32> to vector<1x32xf32>
    %42 = vector.extract_strided_slice %36 {offsets = [5, 0], sizes = [1, 32], strides = [1, 1]} : vector<8x96xf32> to vector<1x32xf32>
    %43 = vector.extract_strided_slice %36 {offsets = [6, 0], sizes = [1, 32], strides = [1, 1]} : vector<8x96xf32> to vector<1x32xf32>
    %44 = vector.extract_strided_slice %36 {offsets = [7, 0], sizes = [1, 32], strides = [1, 1]} : vector<8x96xf32> to vector<1x32xf32>
    %45 = arith.truncf %25 : vector<16x32xf32> to vector<16x32xbf16>
    %cst_25 = arith.constant dense<0.000000e+00> : vector<16x96xf32>
    %46 = tpu.matmul %45, %28, %cst_25 {dimension_numbers = #tpu.dot_dimension_numbers<[1], [0], [0], [1], [0, 0, 1, 1], [], []>} : vector<16x32xbf16>, vector<32x96xbf16>, vector<16x96xf32> -> vector<16x96xf32>
    %47 = vector.broadcast %37 : vector<1x96xf32> to vector<16x96xf32>
    %48 = arith.addf %46, %47 : vector<16x96xf32>
    %49 = vector.extract_strided_slice %48 {offsets = [0, 0], sizes = [16, 16], strides = [1, 1]} : vector<16x96xf32> to vector<16x16xf32>
    %50 = vector.extract_strided_slice %48 {offsets = [0, 16], sizes = [16, 16], strides = [1, 1]} : vector<16x96xf32> to vector<16x16xf32>
    %51 = vector.shape_cast %49 : vector<16x16xf32> to vector<1x16x16xf32>
    %52 = vector.shape_cast %50 : vector<16x16xf32> to vector<1x16x16xf32>
    %53 = tpu.concatenate %51, %52 in 0 : vector<1x16x16xf32>, vector<1x16x16xf32> -> vector<2x16x16xf32>
    %54 = vector.extract_strided_slice %48 {offsets = [0, 32], sizes = [16, 16], strides = [1, 1]} : vector<16x96xf32> to vector<16x16xf32>
    %55 = vector.extract_strided_slice %48 {offsets = [0, 48], sizes = [16, 16], strides = [1, 1]} : vector<16x96xf32> to vector<16x16xf32>
    %56 = vector.shape_cast %54 : vector<16x16xf32> to vector<1x16x16xf32>
    %57 = vector.shape_cast %55 : vector<16x16xf32> to vector<1x16x16xf32>
    %58 = tpu.concatenate %56, %57 in 0 : vector<1x16x16xf32>, vector<1x16x16xf32> -> vector<2x16x16xf32>
    %59 = vector.extract_strided_slice %48 {offsets = [0, 64], sizes = [16, 16], strides = [1, 1]} : vector<16x96xf32> to vector<16x16xf32>
    %60 = vector.extract_strided_slice %48 {offsets = [0, 80], sizes = [16, 16], strides = [1, 1]} : vector<16x96xf32> to vector<16x16xf32>
    %61 = vector.shape_cast %59 : vector<16x16xf32> to vector<1x16x16xf32>
    %62 = vector.shape_cast %60 : vector<16x16xf32> to vector<1x16x16xf32>
    %63 = tpu.concatenate %61, %62 in 0 : vector<1x16x16xf32>, vector<1x16x16xf32> -> vector<2x16x16xf32>
    %cst_26 = arith.constant dense<0.000000e+00> : vector<2x16x16xf32>
    %64 = tpu.matmul %53, %58, %cst_26 {dimension_numbers = #tpu.dot_dimension_numbers<[2], [2], [1], [1], [0, 0, 0, 1, 1, 1], [0], [0]>} : vector<2x16x16xf32>, vector<2x16x16xf32>, vector<2x16x16xf32> -> vector<2x16x16xf32>
    %65 = vector.broadcast %26 : vector<1x16x16xf32> to vector<2x16x16xf32>
    %66 = arith.addf %64, %65 : vector<2x16x16xf32>
    %cst_27 = arith.constant dense<0xFF800000> : vector<2x16xf32>
    %67 = vector.multi_reduction <maximumf>, %66, %cst_27 [2] : vector<2x16x16xf32> to vector<2x16xf32>
    %68 = vector.shape_cast %67 : vector<2x16xf32> to vector<2x16x1xf32>
    %69 = vector.broadcast %68 : vector<2x16x1xf32> to vector<2x16x16xf32>
    %70 = arith.subf %66, %69 : vector<2x16x16xf32>
    %71 = math.exp %70 : vector<2x16x16xf32>
    %cst_28 = arith.constant dense<0.000000e+00> : vector<2x16xf32>
    %72 = vector.multi_reduction <add>, %71, %cst_28 [2] : vector<2x16x16xf32> to vector<2x16xf32>
    %73 = vector.shape_cast %72 : vector<2x16xf32> to vector<2x16x1xf32>
    %74 = tpu.reciprocal %73 {approx = true} : vector<2x16x1xf32> -> vector<2x16x1xf32>
    %75 = vector.broadcast %74 : vector<2x16x1xf32> to vector<2x16x16xf32>
    %76 = arith.mulf %71, %75 : vector<2x16x16xf32>
    %cst_29 = arith.constant dense<0.000000e+00> : vector<2x16x16xf32>
    %77 = tpu.matmul %76, %63, %cst_29 {dimension_numbers = #tpu.dot_dimension_numbers<[2], [1], [1], [2], [0, 0, 0, 1, 1, 2], [0], [0]>} : vector<2x16x16xf32>, vector<2x16x16xf32>, vector<2x16x16xf32> -> vector<2x16x16xf32>
    %78 = vector.extract_strided_slice %77 {offsets = [0, 0, 0], sizes = [1, 16, 16], strides = [1, 1, 1]} : vector<2x16x16xf32> to vector<1x16x16xf32>
    %79 = vector.shape_cast %78 : vector<1x16x16xf32> to vector<16x16xf32>
    %80 = vector.extract_strided_slice %77 {offsets = [1, 0, 0], sizes = [1, 16, 16], strides = [1, 1, 1]} : vector<2x16x16xf32> to vector<1x16x16xf32>
    %81 = vector.shape_cast %80 : vector<1x16x16xf32> to vector<16x16xf32>
    %82 = tpu.concatenate %79, %81 in 1 : vector<16x16xf32>, vector<16x16xf32> -> vector<16x32xf32>
    %83 = arith.truncf %82 : vector<16x32xf32> to vector<16x32xbf16>
    %cst_30 = arith.constant dense<0.000000e+00> : vector<16x32xf32>
    %84 = tpu.matmul %83, %30, %cst_30 {dimension_numbers = #tpu.dot_dimension_numbers<[1], [0], [0], [1], [0, 0, 1, 1], [], []>} : vector<16x32xbf16>, vector<32x32xbf16>, vector<16x32xf32> -> vector<16x32xf32>
    %85 = vector.broadcast %39 : vector<1x32xf32> to vector<16x32xf32>
    %86 = arith.addf %84, %85 : vector<16x32xf32>
    %87 = arith.addf %25, %86 : vector<16x32xf32>
    %cst_31 = arith.constant dense<0.000000e+00> : vector<16xf32>
    %88 = vector.multi_reduction <add>, %87, %cst_31 [1] : vector<16x32xf32> to vector<16xf32>
    %89 = vector.shape_cast %88 : vector<16xf32> to vector<16x1xf32>
    %cst_32 = arith.constant 3.200000e+01 : f32
    %90 = vector.broadcast %cst_32 : f32 to vector<16x1xf32>
    %91 = arith.divf %89, %90 : vector<16x1xf32>
    %92 = vector.broadcast %91 : vector<16x1xf32> to vector<16x32xf32>
    %93 = arith.subf %87, %92 : vector<16x32xf32>
    %94 = arith.mulf %93, %93 : vector<16x32xf32>
    %cst_33 = arith.constant dense<0.000000e+00> : vector<16xf32>
    %95 = vector.multi_reduction <add>, %94, %cst_33 [1] : vector<16x32xf32> to vector<16xf32>
    %96 = vector.shape_cast %95 : vector<16xf32> to vector<16x1xf32>
    %cst_34 = arith.constant 3.200000e+01 : f32
    %97 = vector.broadcast %cst_34 : f32 to vector<16x1xf32>
    %98 = arith.divf %96, %97 : vector<16x1xf32>
    %99 = vector.broadcast %91 : vector<16x1xf32> to vector<16x32xf32>
    %100 = arith.subf %87, %99 : vector<16x32xf32>
    %cst_35 = arith.constant 9.99999996E-13 : f32
    %101 = vector.broadcast %cst_35 : f32 to vector<16x1xf32>
    %102 = arith.addf %98, %101 : vector<16x1xf32>
    %103 = math.rsqrt %102 : vector<16x1xf32>
    %104 = vector.broadcast %103 : vector<16x1xf32> to vector<16x32xf32>
    %105 = arith.mulf %100, %104 : vector<16x32xf32>
    %106 = vector.broadcast %40 : vector<1x32xf32> to vector<16x32xf32>
    %107 = arith.mulf %105, %106 : vector<16x32xf32>
    %108 = vector.broadcast %41 : vector<1x32xf32> to vector<16x32xf32>
    %109 = arith.addf %107, %108 : vector<16x32xf32>
    %110 = arith.truncf %109 : vector<16x32xf32> to vector<16x32xbf16>
    %cst_36 = arith.constant dense<0.000000e+00> : vector<16x64xf32>
    %111 = tpu.matmul %110, %32, %cst_36 {dimension_numbers = #tpu.dot_dimension_numbers<[1], [0], [0], [1], [0, 0, 1, 1], [], []>} : vector<16x32xbf16>, vector<32x64xbf16>, vector<16x64xf32> -> vector<16x64xf32>
    %112 = vector.broadcast %38 : vector<1x64xf32> to vector<16x64xf32>
    %113 = arith.addf %111, %112 : vector<16x64xf32>
    %cst_37 = arith.constant 5.000000e-01 : f32
    %114 = vector.broadcast %cst_37 : f32 to vector<16x64xf32>
    %115 = arith.mulf %114, %113 : vector<16x64xf32>
    %cst_38 = arith.constant 4.471500e-02 : f32
    %116 = vector.broadcast %cst_38 : f32 to vector<16x64xf32>
    %117 = arith.mulf %116, %113 : vector<16x64xf32>
    %118 = arith.mulf %117, %113 : vector<16x64xf32>
    %119 = arith.mulf %118, %113 : vector<16x64xf32>
    %120 = arith.addf %113, %119 : vector<16x64xf32>
    %cst_39 = arith.constant 0.797884583 : f32
    %121 = vector.broadcast %cst_39 : f32 to vector<16x64xf32>
    %122 = arith.mulf %121, %120 : vector<16x64xf32>
    %123 = math.tanh %122 : vector<16x64xf32>
    %cst_40 = arith.constant 1.000000e+00 : f32
    %124 = vector.broadcast %cst_40 : f32 to vector<16x64xf32>
    %125 = arith.addf %124, %123 : vector<16x64xf32>
    %126 = arith.mulf %115, %125 : vector<16x64xf32>
    %127 = arith.truncf %126 : vector<16x64xf32> to vector<16x64xbf16>
    %cst_41 = arith.constant dense<0.000000e+00> : vector<16x32xf32>
    %128 = tpu.matmul %127, %34, %cst_41 {dimension_numbers = #tpu.dot_dimension_numbers<[1], [0], [0], [1], [0, 0, 1, 1], [], []>} : vector<16x64xbf16>, vector<64x32xbf16>, vector<16x32xf32> -> vector<16x32xf32>
    %129 = vector.broadcast %42 : vector<1x32xf32> to vector<16x32xf32>
    %130 = arith.addf %128, %129 : vector<16x32xf32>
    %131 = arith.addf %109, %130 : vector<16x32xf32>
    %cst_42 = arith.constant dense<0.000000e+00> : vector<16xf32>
    %132 = vector.multi_reduction <add>, %131, %cst_42 [1] : vector<16x32xf32> to vector<16xf32>
    %133 = vector.shape_cast %132 : vector<16xf32> to vector<16x1xf32>
    %cst_43 = arith.constant 3.200000e+01 : f32
    %134 = vector.broadcast %cst_43 : f32 to vector<16x1xf32>
    %135 = arith.divf %133, %134 : vector<16x1xf32>
    %136 = vector.broadcast %135 : vector<16x1xf32> to vector<16x32xf32>
    %137 = arith.subf %131, %136 : vector<16x32xf32>
    %138 = arith.mulf %137, %137 : vector<16x32xf32>
    %cst_44 = arith.constant dense<0.000000e+00> : vector<16xf32>
    %139 = vector.multi_reduction <add>, %138, %cst_44 [1] : vector<16x32xf32> to vector<16xf32>
    %140 = vector.shape_cast %139 : vector<16xf32> to vector<16x1xf32>
    %cst_45 = arith.constant 3.200000e+01 : f32
    %141 = vector.broadcast %cst_45 : f32 to vector<16x1xf32>
    %142 = arith.divf %140, %141 : vector<16x1xf32>
    %143 = vector.broadcast %135 : vector<16x1xf32> to vector<16x32xf32>
    %144 = arith.subf %131, %143 : vector<16x32xf32>
    %cst_46 = arith.constant 9.99999996E-13 : f32
    %145 = vector.broadcast %cst_46 : f32 to vector<16x1xf32>
    %146 = arith.addf %142, %145 : vector<16x1xf32>
    %147 = math.rsqrt %146 : vector<16x1xf32>
    %148 = vector.broadcast %147 : vector<16x1xf32> to vector<16x32xf32>
    %149 = arith.mulf %144, %148 : vector<16x32xf32>
    %150 = vector.broadcast %43 : vector<1x32xf32> to vector<16x32xf32>
    %151 = arith.mulf %149, %150 : vector<16x32xf32>
    %152 = vector.broadcast %44 : vector<1x32xf32> to vector<16x32xf32>
    %153 = arith.addf %151, %152 : vector<16x32xf32>
    %c1 = arith.constant 1 : index
    %c0_47 = arith.constant 0 : index
    %c0_48 = arith.constant 0 : index
    %154 = vector.load %arg3[%c1, %c0_47, %c0_48] : memref<2x32x96xbf16, #tpu.memory_space<vmem>>, vector<1x32x96xbf16>
    %155 = vector.shape_cast %154 : vector<1x32x96xbf16> to vector<32x96xbf16>
    %c1_49 = arith.constant 1 : index
    %c0_50 = arith.constant 0 : index
    %c0_51 = arith.constant 0 : index
    %156 = vector.load %arg4[%c1_49, %c0_50, %c0_51] : memref<2x32x32xbf16, #tpu.memory_space<vmem>>, vector<1x32x32xbf16>
    %157 = vector.shape_cast %156 : vector<1x32x32xbf16> to vector<32x32xbf16>
    %c1_52 = arith.constant 1 : index
    %c0_53 = arith.constant 0 : index
    %c0_54 = arith.constant 0 : index
    %158 = vector.load %arg5[%c1_52, %c0_53, %c0_54] : memref<2x32x64xbf16, #tpu.memory_space<vmem>>, vector<1x32x64xbf16>
    %159 = vector.shape_cast %158 : vector<1x32x64xbf16> to vector<32x64xbf16>
    %c1_55 = arith.constant 1 : index
    %c0_56 = arith.constant 0 : index
    %c0_57 = arith.constant 0 : index
    %160 = vector.load %arg6[%c1_55, %c0_56, %c0_57] : memref<2x64x32xbf16, #tpu.memory_space<vmem>>, vector<1x64x32xbf16>
    %161 = vector.shape_cast %160 : vector<1x64x32xbf16> to vector<64x32xbf16>
    %c1_58 = arith.constant 1 : index
    %c0_59 = arith.constant 0 : index
    %c0_60 = arith.constant 0 : index
    %162 = vector.load %arg7[%c1_58, %c0_59, %c0_60] : memref<2x8x96xf32, #tpu.memory_space<vmem>>, vector<1x8x96xf32>
    %163 = vector.shape_cast %162 : vector<1x8x96xf32> to vector<8x96xf32>
    %164 = vector.extract_strided_slice %163 {offsets = [0, 0], sizes = [1, 96], strides = [1, 1]} : vector<8x96xf32> to vector<1x96xf32>
    %165 = vector.extract_strided_slice %163 {offsets = [1, 0], sizes = [1, 64], strides = [1, 1]} : vector<8x96xf32> to vector<1x64xf32>
    %166 = vector.extract_strided_slice %163 {offsets = [2, 0], sizes = [1, 32], strides = [1, 1]} : vector<8x96xf32> to vector<1x32xf32>
    %167 = vector.extract_strided_slice %163 {offsets = [3, 0], sizes = [1, 32], strides = [1, 1]} : vector<8x96xf32> to vector<1x32xf32>
    %168 = vector.extract_strided_slice %163 {offsets = [4, 0], sizes = [1, 32], strides = [1, 1]} : vector<8x96xf32> to vector<1x32xf32>
    %169 = vector.extract_strided_slice %163 {offsets = [5, 0], sizes = [1, 32], strides = [1, 1]} : vector<8x96xf32> to vector<1x32xf32>
    %170 = vector.extract_strided_slice %163 {offsets = [6, 0], sizes = [1, 32], strides = [1, 1]} : vector<8x96xf32> to vector<1x32xf32>
    %171 = vector.extract_strided_slice %163 {offsets = [7, 0], sizes = [1, 32], strides = [1, 1]} : vector<8x96xf32> to vector<1x32xf32>
    %172 = arith.truncf %153 : vector<16x32xf32> to vector<16x32xbf16>
    %cst_61 = arith.constant dense<0.000000e+00> : vector<16x96xf32>
    %173 = tpu.matmul %172, %155, %cst_61 {dimension_numbers = #tpu.dot_dimension_numbers<[1], [0], [0], [1], [0, 0, 1, 1], [], []>} : vector<16x32xbf16>, vector<32x96xbf16>, vector<16x96xf32> -> vector<16x96xf32>
    %174 = vector.broadcast %164 : vector<1x96xf32> to vector<16x96xf32>
    %175 = arith.addf %173, %174 : vector<16x96xf32>
    %176 = vector.extract_strided_slice %175 {offsets = [0, 0], sizes = [16, 16], strides = [1, 1]} : vector<16x96xf32> to vector<16x16xf32>
    %177 = vector.extract_strided_slice %175 {offsets = [0, 16], sizes = [16, 16], strides = [1, 1]} : vector<16x96xf32> to vector<16x16xf32>
    %178 = vector.shape_cast %176 : vector<16x16xf32> to vector<1x16x16xf32>
    %179 = vector.shape_cast %177 : vector<16x16xf32> to vector<1x16x16xf32>
    %180 = tpu.concatenate %178, %179 in 0 : vector<1x16x16xf32>, vector<1x16x16xf32> -> vector<2x16x16xf32>
    %181 = vector.extract_strided_slice %175 {offsets = [0, 32], sizes = [16, 16], strides = [1, 1]} : vector<16x96xf32> to vector<16x16xf32>
    %182 = vector.extract_strided_slice %175 {offsets = [0, 48], sizes = [16, 16], strides = [1, 1]} : vector<16x96xf32> to vector<16x16xf32>
    %183 = vector.shape_cast %181 : vector<16x16xf32> to vector<1x16x16xf32>
    %184 = vector.shape_cast %182 : vector<16x16xf32> to vector<1x16x16xf32>
    %185 = tpu.concatenate %183, %184 in 0 : vector<1x16x16xf32>, vector<1x16x16xf32> -> vector<2x16x16xf32>
    %186 = vector.extract_strided_slice %175 {offsets = [0, 64], sizes = [16, 16], strides = [1, 1]} : vector<16x96xf32> to vector<16x16xf32>
    %187 = vector.extract_strided_slice %175 {offsets = [0, 80], sizes = [16, 16], strides = [1, 1]} : vector<16x96xf32> to vector<16x16xf32>
    %188 = vector.shape_cast %186 : vector<16x16xf32> to vector<1x16x16xf32>
    %189 = vector.shape_cast %187 : vector<16x16xf32> to vector<1x16x16xf32>
    %190 = tpu.concatenate %188, %189 in 0 : vector<1x16x16xf32>, vector<1x16x16xf32> -> vector<2x16x16xf32>
    %cst_62 = arith.constant dense<0.000000e+00> : vector<2x16x16xf32>
    %191 = tpu.matmul %180, %185, %cst_62 {dimension_numbers = #tpu.dot_dimension_numbers<[2], [2], [1], [1], [0, 0, 0, 1, 1, 1], [0], [0]>} : vector<2x16x16xf32>, vector<2x16x16xf32>, vector<2x16x16xf32> -> vector<2x16x16xf32>
    %192 = vector.broadcast %26 : vector<1x16x16xf32> to vector<2x16x16xf32>
    %193 = arith.addf %191, %192 : vector<2x16x16xf32>
    %cst_63 = arith.constant dense<0xFF800000> : vector<2x16xf32>
    %194 = vector.multi_reduction <maximumf>, %193, %cst_63 [2] : vector<2x16x16xf32> to vector<2x16xf32>
    %195 = vector.shape_cast %194 : vector<2x16xf32> to vector<2x16x1xf32>
    %196 = vector.broadcast %195 : vector<2x16x1xf32> to vector<2x16x16xf32>
    %197 = arith.subf %193, %196 : vector<2x16x16xf32>
    %198 = math.exp %197 : vector<2x16x16xf32>
    %cst_64 = arith.constant dense<0.000000e+00> : vector<2x16xf32>
    %199 = vector.multi_reduction <add>, %198, %cst_64 [2] : vector<2x16x16xf32> to vector<2x16xf32>
    %200 = vector.shape_cast %199 : vector<2x16xf32> to vector<2x16x1xf32>
    %201 = tpu.reciprocal %200 {approx = true} : vector<2x16x1xf32> -> vector<2x16x1xf32>
    %202 = vector.broadcast %201 : vector<2x16x1xf32> to vector<2x16x16xf32>
    %203 = arith.mulf %198, %202 : vector<2x16x16xf32>
    %cst_65 = arith.constant dense<0.000000e+00> : vector<2x16x16xf32>
    %204 = tpu.matmul %203, %190, %cst_65 {dimension_numbers = #tpu.dot_dimension_numbers<[2], [1], [1], [2], [0, 0, 0, 1, 1, 2], [0], [0]>} : vector<2x16x16xf32>, vector<2x16x16xf32>, vector<2x16x16xf32> -> vector<2x16x16xf32>
    %205 = vector.extract_strided_slice %204 {offsets = [0, 0, 0], sizes = [1, 16, 16], strides = [1, 1, 1]} : vector<2x16x16xf32> to vector<1x16x16xf32>
    %206 = vector.shape_cast %205 : vector<1x16x16xf32> to vector<16x16xf32>
    %207 = vector.extract_strided_slice %204 {offsets = [1, 0, 0], sizes = [1, 16, 16], strides = [1, 1, 1]} : vector<2x16x16xf32> to vector<1x16x16xf32>
    %208 = vector.shape_cast %207 : vector<1x16x16xf32> to vector<16x16xf32>
    %209 = tpu.concatenate %206, %208 in 1 : vector<16x16xf32>, vector<16x16xf32> -> vector<16x32xf32>
    %210 = arith.truncf %209 : vector<16x32xf32> to vector<16x32xbf16>
    %cst_66 = arith.constant dense<0.000000e+00> : vector<16x32xf32>
    %211 = tpu.matmul %210, %157, %cst_66 {dimension_numbers = #tpu.dot_dimension_numbers<[1], [0], [0], [1], [0, 0, 1, 1], [], []>} : vector<16x32xbf16>, vector<32x32xbf16>, vector<16x32xf32> -> vector<16x32xf32>
    %212 = vector.broadcast %166 : vector<1x32xf32> to vector<16x32xf32>
    %213 = arith.addf %211, %212 : vector<16x32xf32>
    %214 = arith.addf %153, %213 : vector<16x32xf32>
    %cst_67 = arith.constant dense<0.000000e+00> : vector<16xf32>
    %215 = vector.multi_reduction <add>, %214, %cst_67 [1] : vector<16x32xf32> to vector<16xf32>
    %216 = vector.shape_cast %215 : vector<16xf32> to vector<16x1xf32>
    %cst_68 = arith.constant 3.200000e+01 : f32
    %217 = vector.broadcast %cst_68 : f32 to vector<16x1xf32>
    %218 = arith.divf %216, %217 : vector<16x1xf32>
    %219 = vector.broadcast %218 : vector<16x1xf32> to vector<16x32xf32>
    %220 = arith.subf %214, %219 : vector<16x32xf32>
    %221 = arith.mulf %220, %220 : vector<16x32xf32>
    %cst_69 = arith.constant dense<0.000000e+00> : vector<16xf32>
    %222 = vector.multi_reduction <add>, %221, %cst_69 [1] : vector<16x32xf32> to vector<16xf32>
    %223 = vector.shape_cast %222 : vector<16xf32> to vector<16x1xf32>
    %cst_70 = arith.constant 3.200000e+01 : f32
    %224 = vector.broadcast %cst_70 : f32 to vector<16x1xf32>
    %225 = arith.divf %223, %224 : vector<16x1xf32>
    %226 = vector.broadcast %218 : vector<16x1xf32> to vector<16x32xf32>
    %227 = arith.subf %214, %226 : vector<16x32xf32>
    %cst_71 = arith.constant 9.99999996E-13 : f32
    %228 = vector.broadcast %cst_71 : f32 to vector<16x1xf32>
    %229 = arith.addf %225, %228 : vector<16x1xf32>
    %230 = math.rsqrt %229 : vector<16x1xf32>
    %231 = vector.broadcast %230 : vector<16x1xf32> to vector<16x32xf32>
    %232 = arith.mulf %227, %231 : vector<16x32xf32>
    %233 = vector.broadcast %167 : vector<1x32xf32> to vector<16x32xf32>
    %234 = arith.mulf %232, %233 : vector<16x32xf32>
    %235 = vector.broadcast %168 : vector<1x32xf32> to vector<16x32xf32>
    %236 = arith.addf %234, %235 : vector<16x32xf32>
    %237 = arith.truncf %236 : vector<16x32xf32> to vector<16x32xbf16>
    %cst_72 = arith.constant dense<0.000000e+00> : vector<16x64xf32>
    %238 = tpu.matmul %237, %159, %cst_72 {dimension_numbers = #tpu.dot_dimension_numbers<[1], [0], [0], [1], [0, 0, 1, 1], [], []>} : vector<16x32xbf16>, vector<32x64xbf16>, vector<16x64xf32> -> vector<16x64xf32>
    %239 = vector.broadcast %165 : vector<1x64xf32> to vector<16x64xf32>
    %240 = arith.addf %238, %239 : vector<16x64xf32>
    %cst_73 = arith.constant 5.000000e-01 : f32
    %241 = vector.broadcast %cst_73 : f32 to vector<16x64xf32>
    %242 = arith.mulf %241, %240 : vector<16x64xf32>
    %cst_74 = arith.constant 4.471500e-02 : f32
    %243 = vector.broadcast %cst_74 : f32 to vector<16x64xf32>
    %244 = arith.mulf %243, %240 : vector<16x64xf32>
    %245 = arith.mulf %244, %240 : vector<16x64xf32>
    %246 = arith.mulf %245, %240 : vector<16x64xf32>
    %247 = arith.addf %240, %246 : vector<16x64xf32>
    %cst_75 = arith.constant 0.797884583 : f32
    %248 = vector.broadcast %cst_75 : f32 to vector<16x64xf32>
    %249 = arith.mulf %248, %247 : vector<16x64xf32>
    %250 = math.tanh %249 : vector<16x64xf32>
    %cst_76 = arith.constant 1.000000e+00 : f32
    %251 = vector.broadcast %cst_76 : f32 to vector<16x64xf32>
    %252 = arith.addf %251, %250 : vector<16x64xf32>
    %253 = arith.mulf %242, %252 : vector<16x64xf32>
    %254 = arith.truncf %253 : vector<16x64xf32> to vector<16x64xbf16>
    %cst_77 = arith.constant dense<0.000000e+00> : vector<16x32xf32>
    %255 = tpu.matmul %254, %161, %cst_77 {dimension_numbers = #tpu.dot_dimension_numbers<[1], [0], [0], [1], [0, 0, 1, 1], [], []>} : vector<16x64xbf16>, vector<64x32xbf16>, vector<16x32xf32> -> vector<16x32xf32>
    %256 = vector.broadcast %169 : vector<1x32xf32> to vector<16x32xf32>
    %257 = arith.addf %255, %256 : vector<16x32xf32>
    %258 = arith.addf %236, %257 : vector<16x32xf32>
    %cst_78 = arith.constant dense<0.000000e+00> : vector<16xf32>
    %259 = vector.multi_reduction <add>, %258, %cst_78 [1] : vector<16x32xf32> to vector<16xf32>
    %260 = vector.shape_cast %259 : vector<16xf32> to vector<16x1xf32>
    %cst_79 = arith.constant 3.200000e+01 : f32
    %261 = vector.broadcast %cst_79 : f32 to vector<16x1xf32>
    %262 = arith.divf %260, %261 : vector<16x1xf32>
    %263 = vector.broadcast %262 : vector<16x1xf32> to vector<16x32xf32>
    %264 = arith.subf %258, %263 : vector<16x32xf32>
    %265 = arith.mulf %264, %264 : vector<16x32xf32>
    %cst_80 = arith.constant dense<0.000000e+00> : vector<16xf32>
    %266 = vector.multi_reduction <add>, %265, %cst_80 [1] : vector<16x32xf32> to vector<16xf32>
    %267 = vector.shape_cast %266 : vector<16xf32> to vector<16x1xf32>
    %cst_81 = arith.constant 3.200000e+01 : f32
    %268 = vector.broadcast %cst_81 : f32 to vector<16x1xf32>
    %269 = arith.divf %267, %268 : vector<16x1xf32>
    %270 = vector.broadcast %262 : vector<16x1xf32> to vector<16x32xf32>
    %271 = arith.subf %258, %270 : vector<16x32xf32>
    %cst_82 = arith.constant 9.99999996E-13 : f32
    %272 = vector.broadcast %cst_82 : f32 to vector<16x1xf32>
    %273 = arith.addf %269, %272 : vector<16x1xf32>
    %274 = math.rsqrt %273 : vector<16x1xf32>
    %275 = vector.broadcast %274 : vector<16x1xf32> to vector<16x32xf32>
    %276 = arith.mulf %271, %275 : vector<16x32xf32>
    %277 = vector.broadcast %170 : vector<1x32xf32> to vector<16x32xf32>
    %278 = arith.mulf %276, %277 : vector<16x32xf32>
    %279 = vector.broadcast %171 : vector<1x32xf32> to vector<16x32xf32>
    %280 = arith.addf %278, %279 : vector<16x32xf32>
    %281 = vector.extract_strided_slice %280 {offsets = [0, 0], sizes = [1, 32], strides = [1, 1]} : vector<16x32xf32> to vector<1x32xf32>
    %282 = vector.extract_strided_slice %280 {offsets = [8, 0], sizes = [1, 32], strides = [1, 1]} : vector<16x32xf32> to vector<1x32xf32>
    %283 = tpu.concatenate %281, %282 in 0 : vector<1x32xf32>, vector<1x32xf32> -> vector<2x32xf32>
    %c0_83 = arith.constant 0 : index
    %c0_84 = arith.constant 0 : index
    %284 = vector.load %arg8[%c0_83, %c0_84] : memref<2x32xf32, #tpu.memory_space<vmem>>, vector<2x32xf32>
    tpu.vector_store %arg8[%c0_83, %c0_84], %283 {strides = array<i32>} : memref<2x32xf32, #tpu.memory_space<vmem>>, vector<2x32xf32>,
    return
  }
}

</mosaic_0001>

<bundles_post_ra>
// kernel: query_encoder_forward.1
= control target key start
LH: loop header
LB: loop body
LE: loop exit
PB: predicated region body
PF: predicated region fallthrough
CT: control target
= control target key end

     0   :  { %vm34_vm0 = vcmask 261120   ;;  %s1666_s0 = inlined_call_operand.vmem [shape: f32[16,32], index: 0, kind: input, shape index: {}]   ;;  %s1667_s1 = inlined_call_operand.vmem [shape: f32[1,16,16], index: 1, kind: input, shape index: {}]   ;;  %s1668_s2 = inlined_call_operand.vmem [shape: f32[2,32], index: 2, kind: input, shape index: {}]   ;;  %s1669_s3 = inlined_call_operand.vmem [shape: bf16[2,32,96], index: 3, kind: input, shape index: {}]   ;;  %s1670_s4 = inlined_call_operand.vmem [shape: bf16[2,32,32], index: 4, kind: input, shape index: {}]   ;;  %s1671_s5 = inlined_call_operand.vmem [shape: bf16[2,32,64], index: 5, kind: input, shape index: {}]   ;;  %s1672_s6 = inlined_call_operand.vmem [shape: bf16[2,64,32], index: 6, kind: input, shape index: {}]   ;;  %s1673_s7 = inlined_call_operand.vmem [shape: f32[2,8,96], index: 7, kind: input, shape index: {}]   ;;  %s1674_s8 = inlined_call_operand.hbm [shape: f32[2,32], index: 8, kind: output, shape index: {}]  }
   0x1   :  { %v32_v0 = vld [vmem:[%s1666_s0] sm:$0xff] }
   0x2   :  { %13 = vsyncpa [#allocation3], 0  ;;  %v35_v1 = vsel %vm34_vm0, %v32_v0, 0.0  ;;  %v33_v2 = vld [vmem:[%s1666_s0 + $0x8] sm:$0xff]  ;;  %v1359_v4 = vmov 32.0   ;;  %v1215_v23 = vld [vmem:[%s1669_s3] sm:$0xff] }
   0x3   :  { %36 = vadd.xlane.f32.xlu0 %v35_v1  ;;  %v38_v3 = vsel %vm34_vm0, %v33_v2, 0.0  ;;  %1271 = vrcp.f32 %v1359_v4  ;;  %v1216_v21 = vld [vmem:[%s1669_s3 + $0x8] sm:$0xff]  ;;  %v31_v40 = vld [vmem:[%s1668_s2] sm:$0x3]  ;;  %s1360_s15 = smov 96   ;;  %s1361_s16 = smov 112  }
   0x4   :  { %138 = vmatpush.bf16.msra.mxu0 %v1216_v21  ;;  %v86_v43 = vperm.slane %v31_v40, 0  ;;  %v89_v48 = vperm.slane %v31_v40, 1  ;;  %v1445_v53 = vld [vmem:[%s1673_s7] sm:$0xff]  ;;  %vm156_vm8 = vcmask 130048   ;;  %s1363_s23 = smov 16   ;;  %vm505_vm15 = vcmask 523264  }
   0x5   :  { %v116_v54 = vperm.slane %v1445_v53, 0  ;;  %v1465_v1 = vld [vmem:[%s1667_s1] sm:$0xff]  ;;  %s1073_s11 = sshll.u32 %s1674_s8, 4  ;;  %s1074_s11 = int_to_ptr.hbm [resolvable:$true] %s1073_s11 }
   0x8   :  { %139 = vmatpush.bf16.msra.mxu0 %v1215_v23 }
   0x9   :  { %v1272_v5 = vpop.eup %1271 }
   0xa   :  { %v42_v6 = vmul.f32 32.0, %v1272_v5  ;;  %vm46_vm1 = vweird.f32 %v1272_v5 }
   0xb   :  { %39 = vadd.xlane.f32.xlu0 %v38_v3 }
   0xc   :  { %v43_v7 = vsub.f32 1.0, %v42_v6 }
   0xe   :  { %v44_v8 = vmul.f32 %v1272_v5, %v43_v7 }
  0x10   :  { %v45_v9 = vadd.f32 %v1272_v5, %v44_v8 }
  0x12   :  { %v1418_v10 = vsel %vm46_vm1, %v1272_v5, %v45_v9  ;;  %v1472_v5 = vld [vmem:[%s1667_s1 + $0x8] sm:$0xff]  ;;  %s1362_s1 = smov 64  }
  0x76   :  { %v37_v11 = vpop.xlane.xlu0 %36 }
  0x77   :  { %v48_v12 = vmul.f32 %v1418_v10, %v37_v11 }
  0x79   :  { %v50_v13 = vsub.f32 %v32_v0, %v48_v12 }
  0x7b   :  { %v52_v14 = vmul.f32 %v50_v13, %v50_v13 }
  0x7d   :  { %v54_v15 = vsel %vm34_vm0, %v52_v14, 0.0 }
  0x7e   :  { %55 = vadd.xlane.f32.xlu1 %v54_v15  ;;  %v40_v16 = vpop.xlane.xlu0 %39 }
  0x7f   :  { %v49_v17 = vmul.f32 %v1418_v10, %v40_v16 }
  0x81   :  { %v51_v18 = vsub.f32 %v33_v2, %v49_v17 }
  0x83   :  { %v53_v19 = vmul.f32 %v51_v18, %v51_v18 }
  0x85   :  { %v57_v20 = vsel %vm34_vm0, %v53_v19, 0.0 }
  0x86   :  { %58 = vadd.xlane.f32.xlu1 %v57_v20 }
  0xf1   :  { %v56_v22 = vpop.xlane.xlu1 %55 }
  0xf2   :  { %v60_v24 = vmul.f32 %v56_v22, %v1418_v10 }
  0xf4   :  { %v62_v25 = vadd.f32 1e-12, %v60_v24 }
  0xf6   :  { %1273 = vrsqrt.f32 %v62_v25  ;;  %vm70_vm3 = vweird.f32 %v62_v25 }
  0xf9   :  { %v59_v26 = vpop.xlane.xlu1 %58 }
  0xfa   :  { %v61_v27 = vmul.f32 %v59_v26, %v1418_v10 }
  0xfc   :  { %v1274_v28 = vpop.eup %1273  ;;  %v63_v29 = vadd.f32 1e-12, %v61_v27 }
  0xfd   :  { %v65_v30 = vmul.f32 %v1274_v28, %v62_v25  ;;  %vm71_vm2 = vweird.f32 %v1274_v28 }
  0xfe   :  { %1275 = vrsqrt.f32 %v63_v29  ;;  %vm72_vm4 = vmor %vm70_vm3, %vm71_vm2  ;;  %vm80_vm6 = vweird.f32 %v63_v29 }
  0xff   :  { %v66_v31 = vmul.f32 %v1274_v28, %v65_v30 }
 0x101   :  { %v67_v32 = vmul.f32 0.5, %v66_v31 }
 0x103   :  { %v68_v33 = vsub.f32 1.5, %v67_v32 }
 0x104   :  { %v1276_v34 = vpop.eup %1275 }
 0x105   :  { %v69_v35 = vmul.f32 %v1274_v28, %v68_v33  ;;  %v75_v36 = vmul.f32 %v1276_v34, %v63_v29  ;;  %vm81_vm5 = vweird.f32 %v1276_v34 }
 0x106   :  { %vm82_vm7 = vmor %vm80_vm6, %vm81_vm5 }
 0x107   :  { %v76_v37 = vmul.f32 %v1276_v34, %v75_v36  ;;  %v73_v38 = vsel %vm72_vm4, %v1274_v28, %v69_v35 }
 0x108   :  { %v84_v42 = vmul.f32 %v73_v38, %v50_v13 }
 0x109   :  { %v77_v39 = vmul.f32 0.5, %v76_v37 }
 0x10a   :  { %v87_v47 = vmul.f32 %v86_v43, %v84_v42 }
 0x10b   :  { %v78_v41 = vsub.f32 1.5, %v77_v39 }
 0x10c   :  { %v1435_v50 = vadd.f32 %v89_v48, %v87_v47 }
 0x10d   :  { %v79_v44 = vmul.f32 %v1276_v34, %v78_v41 }
 0x10f   :  { %v83_v45 = vsel %vm82_vm7, %v1276_v34, %v79_v44 }
 0x110   :  { %v85_v46 = vmul.f32 %v83_v45, %v51_v18 }
 0x112   :  { %v88_v49 = vmul.f32 %v86_v43, %v85_v46 }
 0x114   :  { %v1437_v51 = vadd.f32 %v89_v48, %v88_v49 }
 0x116   :  { %v115_v52 = vpack.c.bf16 %v1437_v51, %v1435_v50 }
 0x118   :  { %1090 = vmatmul.msk.bf16.vlgmr.msra.gmra.mxu0 %vm34_vm0, %v115_v52 }
 0x195   :  { %v141_v55 = vpop.f32.mrf.mxu0 }
 0x196   :  { %v142_v56 = vadd.f32 %v141_v55, %v116_v54 }
 0x198   :  { %152 = vrot.lane.b32.xlu1 %v142_v56, %s1360_s15 }
 0x19d   :  { %v143_v57 = vpop.f32.mrf.mxu0 }
 0x19e   :  { %v144_v58 = vadd.f32 %v143_v57, %v116_v54 }
 0x1a0   :  { %154 = vrot.lane.b32.xlu0 %v144_v58, %s1360_s15  ;;  %150 = vrot.lane.b32.xlu2 %v144_v58, %s1361_s16  ;;  %v1241_v16 = vpack.i.bf16 %v142_v56, %v144_v58 }
 0x1a8   :  { %148 = vrot.lane.b32.xlu2 %v142_v56, %s1361_s16 }
 0x1fa   :  { %v151_v59 = vpop.permute.xlu2 %150 }
 0x1fb   :  { %190 = vrot.lane.b32.xlu2 %v151_v59, %s1360_s15 }
 0x202   :  { %v149_v60 = vpop.permute.xlu2 %148 }
 0x203   :  { %188 = vrot.lane.b32.xlu2 %v149_v60, %s1360_s15  ;;  %v1246_v27 = vpack.i.bf16 %v149_v60, %v151_v59 }
 0x20a   :  { %v153_v62 = vpop.permute.xlu1 %152 }
 0x212   :  { %v155_v61 = vpop.permute.xlu0 %154 }
 0x213   :  { %1091 = vmatpush.xpose.msk.msra.mxu1 %vm156_vm8, %v155_v61 }
 0x217   :  { %1092 = vmatpush.xpose.msk.msra.mxu1 %vm156_vm8, %v153_v62 }
 0x21a   :  { %1093 = vmatmul.msk.f32.vlgmr.msra.gmra.mxu1 %vm156_vm8, %v142_v56 }
 0x222   :  { %1094 = vmatmul.msk.f32.gmra.mxu1 %vm156_vm8, %v144_v58 }
 0x255   :  { %v191_v63 = vpop.permute.xlu2 %190 }
 0x256   :  { %1095 = vmatpush.xpose.msk.msra.mxu2 %vm156_vm8, %v191_v63 }
 0x25d   :  { %v189_v0 = vpop.permute.xlu2 %188 }
 0x25e   :  { %1096 = vmatpush.xpose.msk.msra.mxu2 %vm156_vm8, %v189_v0 }
 0x261   :  { %1097 = vmatmul.msk.f32.vlgmr.msra.gmra.mxu2 %vm156_vm8, %v149_v60 }
 0x269   :  { %1098 = vmatmul.msk.f32.gmra.mxu2 %vm156_vm8, %v151_v59  ;;  %v1218_v59 = vld [vmem:[%s1670_s4 + $0x8] sm:$0xff] }
 0x26a   :  { %370 = vmatpush.bf16.msrb.mxu0 %v1218_v59 }
 0x297   :  { %v182_v2 = vpop.f32.mrf.mxu1 }
 0x298   :  { %v183_v3 = vadd.f32 %v182_v2, %v1465_v1  ;;  %v1217_v2 = vld [vmem:[%s1670_s4] sm:$0xff] }
 0x299   :  { %371 = vmatpush.bf16.msrb.mxu0 %v1217_v2  ;;  %v1221_v2 = vld [vmem:[%s1672_s6] sm:$0xff] }
 0x29a   :  { %v223_v4 = vsel %vm156_vm8, %v183_v3, -inf }
 0x29b   :  { %224 = vmax.xlane.f32.xlu2 %v223_v4 }
 0x29f   :  { %v185_v6 = vpop.f32.mrf.mxu1 }
 0x2a0   :  { %v186_v7 = vadd.f32 %v185_v6, %v1472_v5 }
 0x2a2   :  { %v226_v8 = vsel %vm156_vm8, %v186_v7, -inf }
 0x2a3   :  { %227 = vmax.xlane.f32.xlu0 %v226_v8 }
 0x2e4   :  { %v217_v9 = vpop.f32.mrf.mxu2 }
 0x2e5   :  { %v218_v11 = vadd.f32 %v217_v9, %v1465_v1 }
 0x2e7   :  { %v229_v12 = vsel %vm156_vm8, %v218_v11, -inf }
 0x2e8   :  { %230 = vmax.xlane.f32.xlu1 %v229_v12 }
 0x2ec   :  { %v220_v13 = vpop.f32.mrf.mxu2 }
 0x2ed   :  { %v221_v14 = vadd.f32 %v220_v13, %v1472_v5 }
 0x2ef   :  { %v232_v15 = vsel %vm156_vm8, %v221_v14, -inf }
 0x2f0   :  { %233 = vmax.xlane.f32.xlu2 %v232_v15 }
 0x308   :  { %1242 = vrot.lane.b32.xlu2 %v1241_v16, %s1362_s1 }
 0x30e   :  { %v225_v17 = vpop.xlane.xlu2 %224 }
 0x30f   :  { %v235_v18 = vsub.f32 %v183_v3, %v225_v17 }
 0x311   :  { %v239_v19 = vmul.f32 1.442695, %v235_v18 }
 0x313   :  { %1277 = vpow2.f32 %v239_v19 }
 0x316   :  { %v228_v20 = vpop.xlane.xlu0 %227 }
 0x317   :  { %v236_v21 = vsub.f32 %v186_v7, %v228_v20 }
 0x319   :  { %v1278_v22 = vpop.eup %1277  ;;  %v241_v23 = vmul.f32 1.442695, %v236_v21 }
 0x31a   :  { %v247_v24 = vsel %vm156_vm8, %v1278_v22, 0.0 }
 0x31b   :  { %1279 = vpow2.f32 %v241_v23  ;;  %248 = vadd.xlane.f32.xlu0 %v247_v24 }
 0x321   :  { %v1280_v25 = vpop.eup %1279 }
 0x322   :  { %v250_v26 = vsel %vm156_vm8, %v1280_v25, 0.0 }
 0x323   :  { %251 = vadd.xlane.f32.xlu1 %v250_v26 }
 0x33c   :  { %1247 = vrot.lane.b32.xlu1 %v1246_v27, %s1362_s1 }
 0x35b   :  { %v231_v28 = vpop.xlane.xlu1 %230 }
 0x35c   :  { %v237_v29 = vsub.f32 %v218_v11, %v231_v28  ;;  %v348_v11 = vperm.slane %v1445_v53, 2 }
 0x35e   :  { %v243_v30 = vmul.f32 1.442695, %v237_v29 }
 0x360   :  { %1281 = vpow2.f32 %v243_v30  ;;  %v1219_v30 = vld [vmem:[%s1671_s5] sm:$0xff] }
 0x363   :  { %v234_v31 = vpop.xlane.xlu2 %233 }
 0x364   :  { %v238_v32 = vsub.f32 %v221_v14, %v234_v31 }
 0x366   :  { %v1282_v33 = vpop.eup %1281  ;;  %v245_v34 = vmul.f32 1.442695, %v238_v32 }
 0x367   :  { %v253_v35 = vsel %vm156_vm8, %v1282_v33, 0.0 }
 0x368   :  { %1283 = vpow2.f32 %v245_v34  ;;  %254 = vadd.xlane.f32.xlu0 %v253_v35 }
 0x36b   :  { %v1243_v36 = vpop.permute.xlu2 %1242 }
 0x36c   :  { %v1244_v37 = vunpack.i.l.bf16 %v1243_v36  ;;  %v1245_v39 = vunpack.i.h.bf16 %v1243_v36 }
 0x36e   :  { %v1284_v38 = vpop.eup %1283  ;;  %293 = vmatpush.msra.mxu3 %v1244_v37 }
 0x36f   :  { %v256_v40 = vsel %vm156_vm8, %v1284_v38, 0.0 }
 0x370   :  { %257 = vadd.xlane.f32.xlu0 %v256_v40  ;;  %294 = vmatpush.msra.mxu3 %v1245_v39 }
 0x38e   :  { %v249_v41 = vpop.xlane.xlu0 %248 }
 0x38f   :  { %1285 = vrcp.f32 %v249_v41 }
 0x395   :  { %v1286_v42 = vpop.eup %1285 }
 0x396   :  { %v252_v43 = vpop.xlane.xlu1 %251  ;;  %v263_v44 = vmul.f32 %v1286_v42, %v1278_v22 }
 0x397   :  { %1287 = vrcp.f32 %v252_v43 }
 0x398   :  { %1099 = vmatmul.msk.f32.vlgmr.msra.gmra.mxu3 %vm156_vm8, %v263_v44 }
 0x39d   :  { %v1288_v45 = vpop.eup %1287 }
 0x39e   :  { %v264_v46 = vmul.f32 %v1288_v45, %v1280_v25 }
 0x3a0   :  { %1100 = vmatmul.msk.f32.gmra.mxu3 %vm156_vm8, %v264_v46 }
 0x3ae   :  { %v1248_v47 = vpop.permute.xlu1 %1247 }
 0x3af   :  { %v1249_v48 = vunpack.i.l.bf16 %v1248_v47  ;;  %v1250_v49 = vunpack.i.h.bf16 %v1248_v47 }
 0x3b1   :  { %328 = vmatpush.msrb.mxu3 %v1249_v48 }
 0x3b3   :  { %329 = vmatpush.msrb.mxu3 %v1250_v49  ;;  %v424_v49 = vperm.slane %v1445_v53, 3 }
 0x3db   :  { %v255_v52 = vpop.xlane.xlu0 %254 }
 0x3dc   :  { %1289 = vrcp.f32 %v255_v52 }
 0x3e2   :  { %v1290_v54 = vpop.eup %1289 }
 0x3e3   :  { %v258_v55 = vpop.xlane.xlu0 %257  ;;  %v265_v56 = vmul.f32 %v1290_v54, %v1282_v33 }
 0x3e4   :  { %1291 = vrcp.f32 %v258_v55 }
 0x3e5   :  { %1101 = vmatmul.msk.f32.vlgmr.msrb.gmra.mxu3 %vm156_vm8, %v265_v56 }
 0x3ea   :  { %v1292_v57 = vpop.eup %1291 }
 0x3eb   :  { %v266_v58 = vmul.f32 %v1292_v57, %v1284_v38  ;;  %v427_v57 = vperm.slane %v1445_v53, 4 }
 0x3ed   :  { %1102 = vmatmul.msk.f32.gmra.mxu3 %vm156_vm8, %v266_v58 }
 0x41b   :  { %v296_v60 = vpop.f32.mrf.mxu3 }
 0x423   :  { %v299_v61 = vpop.f32.mrf.mxu3 }
 0x468   :  { %v331_v62 = vpop.f32.mrf.mxu3 }
 0x470   :  { %v334_v63 = vpop.f32.mrf.mxu3 }
 0x471   :  { %v1251_v0 = vpack.i.bf16 %v334_v63, %v331_v62  ;;  %v1224_v62 = vld [vmem:[%s1672_s6 + $0x18] sm:$0xff]  ;;  %v1223_v63 = vld [vmem:[%s1672_s6 + $0x10] sm:$0xff] }
 0x472   :  { %513 = vmatpush.bf16.msrb.mxu2 %v1224_v62 }
 0x473   :  { %1252 = vrot.lane.b32.xlu0 %v1251_v0, %s1363_s23  ;;  %v1222_v0 = vld [vmem:[%s1672_s6 + $0x8] sm:$0xff] }
 0x476   :  { %514 = vmatpush.bf16.msrb.mxu2 %v1223_v63 }
 0x47a   :  { %515 = vmatpush.bf16.msrb.mxu2 %v1222_v0 }
 0x47e   :  { %516 = vmatpush.bf16.msrb.mxu2 %v1221_v2 }
 0x4e5   :  { %v1253_v3 = vpop.permute.xlu0 %1252 }
 0x4e6   :  { %v1255_v4 = vunpack.i.h.bf16 %v1253_v3  ;;  %v1254_v6 = vunpack.i.l.bf16 %v1253_v3  ;;  %v431_v3 = vperm.slane %v1445_v53, 1 }
 0x4e8   :  { %v346_v7 = vsel %vm156_vm8, %v299_v61, %v1255_v4  ;;  %v345_v8 = vsel %vm156_vm8, %v296_v60, %v1254_v6 }
 0x4e9   :  { %v347_v9 = vpack.c.bf16 %v346_v7, %v345_v8 }
 0x4eb   :  { %1111 = vmatmul.msk.bf16.vlgmr.msrb.gmra.mxu0 %vm34_vm0, %v347_v9 }
 0x568   :  { %v373_v12 = vpop.f32.mrf.mxu0 }
 0x569   :  { %v374_v13 = vadd.f32 %v373_v12, %v348_v11 }
 0x56b   :  { %v378_v14 = vadd.f32 %v374_v13, %v1435_v50 }
 0x56d   :  { %v380_v15 = vsel %vm34_vm0, %v378_v14, 0.0 }
 0x56e   :  { %381 = vadd.xlane.f32.xlu2 %v380_v15 }
 0x570   :  { %v375_v16 = vpop.f32.mrf.mxu0 }
 0x571   :  { %v376_v17 = vadd.f32 %v375_v16, %v348_v11 }
 0x573   :  { %v379_v18 = vadd.f32 %v376_v17, %v1437_v51  ;;  %v1220_v51 = vld [vmem:[%s1671_s5 + $0x8] sm:$0xff] }
 0x574   :  { %453 = vmatpush.bf16.msrb.mxu1 %v1220_v51 }
 0x575   :  { %v383_v19 = vsel %vm34_vm0, %v379_v18, 0.0 }
 0x576   :  { %384 = vadd.xlane.f32.xlu1 %v383_v19 }
 0x578   :  { %454 = vmatpush.bf16.msrb.mxu1 %v1219_v30 }
 0x5e1   :  { %v382_v20 = vpop.xlane.xlu2 %381 }
 0x5e2   :  { %v386_v21 = vmul.f32 %v382_v20, %v1418_v10 }
 0x5e4   :  { %v388_v22 = vsub.f32 %v378_v14, %v386_v21 }
 0x5e6   :  { %v390_v23 = vmul.f32 %v388_v22, %v388_v22 }
 0x5e8   :  { %v392_v24 = vsel %vm34_vm0, %v390_v23, 0.0 }
 0x5e9   :  { %v385_v25 = vpop.xlane.xlu1 %384  ;;  %393 = vadd.xlane.f32.xlu0 %v392_v24 }
 0x5ea   :  { %v387_v50 = vmul.f32 %v385_v25, %v1418_v10 }
 0x5ec   :  { %v389_v26 = vsub.f32 %v379_v18, %v387_v50 }
 0x5ee   :  { %v391_v27 = vmul.f32 %v389_v26, %v389_v26 }
 0x5f0   :  { %v395_v28 = vsel %vm34_vm0, %v391_v27, 0.0 }
 0x5f1   :  { %396 = vadd.xlane.f32.xlu2 %v395_v28  ;;  %v480_v28 = vperm.slane %v1445_v53, 5 }
 0x65c   :  { %v394_v29 = vpop.xlane.xlu0 %393 }
 0x65d   :  { %v398_v31 = vmul.f32 %v394_v29, %v1418_v10 }
 0x65f   :  { %v400_v32 = vadd.f32 1e-12, %v398_v31 }
 0x661   :  { %1293 = vrsqrt.f32 %v400_v32  ;;  %vm408_vm10 = vweird.f32 %v400_v32 }
 0x664   :  { %v397_v33 = vpop.xlane.xlu2 %396 }
 0x665   :  { %v399_v34 = vmul.f32 %v397_v33, %v1418_v10 }
 0x667   :  { %v1294_v35 = vpop.eup %1293  ;;  %v401_v36 = vadd.f32 1e-12, %v399_v34 }
 0x668   :  { %v403_v37 = vmul.f32 %v1294_v35, %v400_v32  ;;  %vm409_vm9 = vweird.f32 %v1294_v35 }
 0x669   :  { %1295 = vrsqrt.f32 %v401_v36  ;;  %vm410_vm11 = vmor %vm408_vm10, %vm409_vm9  ;;  %vm418_vm13 = vweird.f32 %v401_v36 }
 0x66a   :  { %v404_v38 = vmul.f32 %v1294_v35, %v403_v37 }
 0x66c   :  { %v405_v39 = vmul.f32 0.5, %v404_v38 }
 0x66e   :  { %v406_v40 = vsub.f32 1.5, %v405_v39 }
 0x66f   :  { %v1296_v41 = vpop.eup %1295 }
 0x670   :  { %v407_v42 = vmul.f32 %v1294_v35, %v406_v40  ;;  %v413_v43 = vmul.f32 %v1296_v41, %v401_v36  ;;  %vm419_vm12 = vweird.f32 %v1296_v41 }
 0x671   :  { %vm420_vm14 = vmor %vm418_vm13, %vm419_vm12 }
 0x672   :  { %v414_v44 = vmul.f32 %v1296_v41, %v413_v43  ;;  %v411_v45 = vsel %vm410_vm11, %v1294_v35, %v407_v42 }
 0x673   :  { %v422_v48 = vmul.f32 %v411_v45, %v388_v22 }
 0x674   :  { %v415_v46 = vmul.f32 0.5, %v414_v44 }
 0x675   :  { %v425_v56 = vmul.f32 %v424_v49, %v422_v48 }
 0x676   :  { %v416_v47 = vsub.f32 1.5, %v415_v46  ;;  %v1226_v46 = vld [vmem:[%s1669_s3 + $0x18] sm:$0xff] }
 0x677   :  { %v428_v59 = vadd.f32 %v427_v57, %v425_v56  ;;  %624 = vmatpush.bf16.msra.mxu3 %v1226_v46 }
 0x678   :  { %v417_v52 = vmul.f32 %v1296_v41, %v416_v47 }
 0x67a   :  { %v421_v54 = vsel %vm420_vm14, %v1296_v41, %v417_v52 }
 0x67b   :  { %v423_v55 = vmul.f32 %v421_v54, %v389_v26 }
 0x67d   :  { %v426_v58 = vmul.f32 %v424_v49, %v423_v55  ;;  %v1225_v49 = vld [vmem:[%s1669_s3 + $0x10] sm:$0xff] }
 0x67e   :  { %625 = vmatpush.bf16.msra.mxu3 %v1225_v49 }
 0x67f   :  { %v429_v60 = vadd.f32 %v427_v57, %v426_v58 }
 0x681   :  { %v430_v61 = vpack.c.bf16 %v429_v60, %v428_v59 }
 0x683   :  { %1120 = vmatmul.msk.bf16.vlgmr.msrb.gmra.mxu1 %vm34_vm0, %v430_v61 }
 0x700   :  { %v456_v4 = vpop.f32.mrf.mxu1 }
 0x701   :  { %v457_v6 = vadd.f32 %v456_v4, %v431_v3 }
 0x703   :  { %v463_v7 = vmul.f32 0.044715, %v457_v6  ;;  %v461_v23 = vmul.f32 0.5, %v457_v6 }
 0x705   :  { %v465_v8 = vmul.f32 %v463_v7, %v457_v6  ;;  %v569_v7 = vperm.slane %v1445_v53, 6 }
 0x707   :  { %v467_v9 = vmul.f32 %v465_v8, %v457_v6 }
 0x708   :  { %v458_v11 = vpop.f32.mrf.mxu1 }
 0x709   :  { %v469_v12 = vadd.f32 %v467_v9, %v457_v6  ;;  %v459_v13 = vadd.f32 %v458_v11, %v431_v3 }
 0x70b   :  { %v464_v14 = vmul.f32 0.044715, %v459_v13  ;;  %v471_v15 = vmul.f32 0.7978846, %v469_v12  ;;  %v462_v24 = vmul.f32 0.5, %v459_v13  ;;  %v572_v12 = vperm.slane %v1445_v53, 7 }
 0x70d   :  { %v466_v16 = vmul.f32 %v464_v14, %v459_v13  ;;  %1297 = vtanh.f32 %v471_v15 }
 0x70f   :  { %v468_v17 = vmul.f32 %v466_v16, %v459_v13 }
 0x711   :  { %v470_v18 = vadd.f32 %v468_v17, %v459_v13 }
 0x713   :  { %v472_v19 = vmul.f32 0.7978846, %v470_v18  ;;  %v1298_v20 = vpop.eup %1297 }
 0x714   :  { %v475_v21 = vadd.f32 1.0, %v1298_v20 }
 0x715   :  { %1299 = vtanh.f32 %v472_v19  ;;  %v1561_v19 = vld [vmem:[%s1673_s7 + $0x8] sm:$0xff] }
 0x716   :  { %v477_v50 = vmul.f32 %v475_v21, %v461_v23  ;;  %v602_v20 = vperm.slane %v1561_v19, 0 }
 0x71b   :  { %v1300_v22 = vpop.eup %1299 }
 0x71c   :  { %v476_v25 = vadd.f32 1.0, %v1300_v22 }
 0x71e   :  { %v478_v26 = vmul.f32 %v476_v25, %v462_v24 }
 0x720   :  { %v479_v27 = vpack.c.bf16 %v478_v26, %v477_v50 }
 0x722   :  { %1137 = vmatmul.msk.bf16.vlgmr.msrb.gmra.mxu2 %vm505_vm15, %v479_v27 }
 0x7a5   :  { %v518_v51 = vpop.f32.mrf.mxu2 }
 0x7a6   :  { %v519_v29 = vadd.f32 %v518_v51, %v480_v28 }
 0x7a8   :  { %v523_v30 = vadd.f32 %v519_v29, %v428_v59 }
 0x7aa   :  { %v525_v31 = vsel %vm34_vm0, %v523_v30, 0.0 }
 0x7ab   :  { %526 = vadd.xlane.f32.xlu2 %v525_v31 }
 0x7ad   :  { %v520_v32 = vpop.f32.mrf.mxu2 }
 0x7ae   :  { %v521_v33 = vadd.f32 %v520_v32, %v480_v28 }
 0x7b0   :  { %v524_v34 = vadd.f32 %v521_v33, %v429_v60 }
 0x7b2   :  { %v528_v35 = vsel %vm34_vm0, %v524_v34, 0.0 }
 0x7b3   :  { %529 = vadd.xlane.f32.xlu1 %v528_v35 }
 0x81e   :  { %v527_v36 = vpop.xlane.xlu2 %526 }
 0x81f   :  { %v531_v37 = vmul.f32 %v527_v36, %v1418_v10 }
 0x821   :  { %v533_v38 = vsub.f32 %v523_v30, %v531_v37 }
 0x823   :  { %v535_v39 = vmul.f32 %v533_v38, %v533_v38 }
 0x825   :  { %v537_v40 = vsel %vm34_vm0, %v535_v39, 0.0 }
 0x826   :  { %v530_v41 = vpop.xlane.xlu1 %529  ;;  %538 = vadd.xlane.f32.xlu2 %v537_v40 }
 0x827   :  { %v532_v42 = vmul.f32 %v530_v41, %v1418_v10 }
 0x829   :  { %v534_v43 = vsub.f32 %v524_v34, %v532_v42 }
 0x82b   :  { %v536_v44 = vmul.f32 %v534_v43, %v534_v43 }
 0x82d   :  { %v540_v45 = vsel %vm34_vm0, %v536_v44, 0.0 }
 0x82e   :  { %541 = vadd.xlane.f32.xlu0 %v540_v45 }
 0x899   :  { %v539_v47 = vpop.xlane.xlu2 %538 }
 0x89a   :  { %v543_v48 = vmul.f32 %v539_v47, %v1418_v10 }
 0x89c   :  { %v545_v52 = vadd.f32 1e-12, %v543_v48 }
 0x89e   :  { %1301 = vrsqrt.f32 %v545_v52  ;;  %vm553_vm2 = vweird.f32 %v545_v52 }
 0x8a1   :  { %v542_v54 = vpop.xlane.xlu0 %541 }
 0x8a2   :  { %v544_v55 = vmul.f32 %v542_v54, %v1418_v10 }
 0x8a4   :  { %v1302_v56 = vpop.eup %1301  ;;  %v546_v57 = vadd.f32 1e-12, %v544_v55 }
 0x8a5   :  { %v548_v58 = vmul.f32 %v1302_v56, %v545_v52  ;;  %vm554_vm1 = vweird.f32 %v1302_v56 }
 0x8a6   :  { %1303 = vrsqrt.f32 %v546_v57  ;;  %vm555_vm3 = vmor %vm553_vm2, %vm554_vm1  ;;  %vm563_vm5 = vweird.f32 %v546_v57 }
 0x8a7   :  { %v549_v59 = vmul.f32 %v1302_v56, %v548_v58 }
 0x8a9   :  { %v550_v60 = vmul.f32 0.5, %v549_v59 }
 0x8ab   :  { %v551_v61 = vsub.f32 1.5, %v550_v60 }
 0x8ac   :  { %v1304_v62 = vpop.eup %1303 }
 0x8ad   :  { %v552_v63 = vmul.f32 %v1302_v56, %v551_v61  ;;  %v558_v0 = vmul.f32 %v1304_v62, %v546_v57  ;;  %vm564_vm4 = vweird.f32 %v1304_v62 }
 0x8ae   :  { %vm565_vm6 = vmor %vm563_vm5, %vm564_vm4  ;;  %vm1064_vm4 = vcmask 254976  }
 0x8af   :  { %v559_v2 = vmul.f32 %v1304_v62, %v558_v0  ;;  %v556_v3 = vsel %vm555_vm3, %v1302_v56, %v552_v63  ;;  %vm1062_vm3 = vcmask 1040384  }
 0x8b0   :  { %v567_v8 = vmul.f32 %v556_v3, %v533_v38 }
 0x8b1   :  { %v560_v4 = vmul.f32 0.5, %v559_v2 }
 0x8b2   :  { %v570_v13 = vmul.f32 %v569_v7, %v567_v8 }
 0x8b3   :  { %v561_v6 = vsub.f32 1.5, %v560_v4 }
 0x8b4   :  { %v1551_v16 = vadd.f32 %v572_v12, %v570_v13 }
 0x8b5   :  { %v562_v9 = vmul.f32 %v1304_v62, %v561_v6 }
 0x8b7   :  { %v566_v11 = vsel %vm565_vm6, %v1304_v62, %v562_v9 }
 0x8b8   :  { %v568_v14 = vmul.f32 %v566_v11, %v534_v43 }
 0x8ba   :  { %v571_v15 = vmul.f32 %v569_v7, %v568_v14 }
 0x8bc   :  { %v1553_v17 = vadd.f32 %v572_v12, %v571_v15 }
 0x8be   :  { %v601_v18 = vpack.c.bf16 %v1553_v17, %v1551_v16 }
 0x8c0   :  { %1167 = vmatmul.msk.bf16.vlgmr.msra.gmra.mxu3 %vm34_vm0, %v601_v18 }
 0x943   :  { %v627_v53 = vpop.f32.mrf.mxu3 }
 0x944   :  { %v1564_v21 = vadd.f32 %v627_v53, %v602_v20 }
 0x946   :  { %634 = vrot.lane.b32.xlu2 %v1564_v21, %s1361_s16 }
 0x94b   :  { %v629_v22 = vpop.f32.mrf.mxu3 }
 0x94c   :  { %v1568_v23 = vadd.f32 %v629_v22, %v602_v20 }
 0x94e   :  { %636 = vrot.lane.b32.xlu1 %v1568_v23, %s1361_s16  ;;  %638 = vrot.lane.b32.xlu2 %v1564_v21, %s1360_s15  ;;  %v1261_v2 = vpack.i.bf16 %v1564_v21, %v1568_v23 }
 0x9a0   :  { %v635_v24 = vpop.permute.xlu2 %634 }
 0x9a1   :  { %673 = vrot.lane.b32.xlu1 %v635_v24, %s1360_s15 }
 0x9a8   :  { %v639_v28 = vpop.permute.xlu2 %638 }
 0x9c0   :  { %v637_v25 = vpop.permute.xlu1 %636 }
 0x9c1   :  { %675 = vrot.lane.b32.xlu0 %v637_v25, %s1360_s15  ;;  %v1256_v40 = vpack.i.bf16 %v635_v24, %v637_v25 }
 0x9c9   :  { %640 = vrot.lane.b32.xlu0 %v1568_v23, %s1360_s15 }
 0xa13   :  { %v674_v26 = vpop.permute.xlu1 %673 }
 0xa33   :  { %v676_v50 = vpop.permute.xlu0 %675 }
 0xa34   :  { %1172 = vmatpush.xpose.msk.msra.mxu1 %vm156_vm8, %v676_v50  ;;  %v1227_v50 = vld [vmem:[%s1670_s4 + $0x10] sm:$0xff] }
 0xa38   :  { %1173 = vmatpush.xpose.msk.msra.mxu1 %vm156_vm8, %v674_v26 }
 0xa3b   :  { %v641_v27 = vpop.permute.xlu0 %640  ;;  %1174 = vmatmul.msk.f32.vlgmr.msra.gmra.mxu1 %vm156_vm8, %v635_v24 }
 0xa3c   :  { %1168 = vmatpush.xpose.msk.msra.mxu0 %vm156_vm8, %v641_v27 }
 0xa40   :  { %1169 = vmatpush.xpose.msk.msra.mxu0 %vm156_vm8, %v639_v28 }
 0xa43   :  { %1170 = vmatmul.msk.f32.vlgmr.msra.gmra.mxu0 %vm156_vm8, %v1564_v21  ;;  %1175 = vmatmul.msk.f32.gmra.mxu1 %vm156_vm8, %v637_v25 }
 0xa4b   :  { %1171 = vmatmul.msk.f32.gmra.mxu0 %vm156_vm8, %v1568_v23  ;;  %v1228_v23 = vld [vmem:[%s1670_s4 + $0x18] sm:$0xff] }
 0xa4c   :  { %855 = vmatpush.bf16.msrb.mxu0 %v1228_v23  ;;  %v1234_v23 = vld [vmem:[%s1672_s6 + $0x38] sm:$0xff] }
 0xa50   :  { %856 = vmatpush.bf16.msrb.mxu0 %v1227_v50  ;;  %v1231_v50 = vld [vmem:[%s1672_s6 + $0x20] sm:$0xff] }
 0xab8   :  { %v702_v51 = vpop.f32.mrf.mxu1 }
 0xab9   :  { %v703_v29 = vadd.f32 %v702_v51, %v1465_v1 }
 0xabb   :  { %v714_v30 = vsel %vm156_vm8, %v703_v29, -inf }
 0xabc   :  { %715 = vmax.xlane.f32.xlu1 %v714_v30 }
 0xac0   :  { %v667_v31 = vpop.f32.mrf.mxu0  ;;  %v705_v32 = vpop.f32.mrf.mxu1 }
 0xac1   :  { %v668_v33 = vadd.f32 %v667_v31, %v1465_v1  ;;  %v706_v34 = vadd.f32 %v705_v32, %v1472_v5 }
 0xac3   :  { %v708_v35 = vsel %vm156_vm8, %v668_v33, -inf  ;;  %v717_v36 = vsel %vm156_vm8, %v706_v34, -inf }
 0xac4   :  { %709 = vmax.xlane.f32.xlu2 %v708_v35  ;;  %718 = vmax.xlane.f32.xlu0 %v717_v36 }
 0xac8   :  { %v670_v37 = vpop.f32.mrf.mxu0 }
 0xac9   :  { %v671_v38 = vadd.f32 %v670_v37, %v1472_v5 }
 0xacb   :  { %v711_v39 = vsel %vm156_vm8, %v671_v38, -inf }
 0xacc   :  { %712 = vmax.xlane.f32.xlu1 %v711_v39 }
 0xadc   :  { %1257 = vrot.lane.b32.xlu2 %v1256_v40, %s1362_s1 }
 0xb2f   :  { %v716_v41 = vpop.xlane.xlu1 %715 }
 0xb30   :  { %v722_v42 = vsub.f32 %v703_v29, %v716_v41 }
 0xb32   :  { %v728_v1 = vmul.f32 1.442695, %v722_v42 }
 0xb34   :  { %1305 = vpow2.f32 %v728_v1 }
 0xb37   :  { %v710_v43 = vpop.xlane.xlu2 %709  ;;  %v719_v44 = vpop.xlane.xlu0 %718 }
 0xb38   :  { %v720_v45 = vsub.f32 %v668_v33, %v710_v43  ;;  %v723_v46 = vsub.f32 %v706_v34, %v719_v44  ;;  %v833_v33 = vperm.slane %v1561_v19, 2 }
 0xb3a   :  { %v1306_v47 = vpop.eup %1305  ;;  %v724_v48 = vmul.f32 1.442695, %v720_v45  ;;  %v730_v49 = vmul.f32 1.442695, %v723_v46 }
 0xb3b   :  { %v738_v52 = vsel %vm156_vm8, %v1306_v47, 0.0 }
 0xb3c   :  { %1307 = vpow2.f32 %v724_v48  ;;  %739 = vadd.xlane.f32.xlu0 %v738_v52 }
 0xb3d   :  { %1309 = vpow2.f32 %v730_v49 }
 0xb3f   :  { %v1258_v5 = vpop.permute.xlu2 %1257  ;;  %v713_v54 = vpop.xlane.xlu1 %712 }
 0xb40   :  { %v1259_v55 = vunpack.i.l.bf16 %v1258_v5  ;;  %v721_v56 = vsub.f32 %v671_v38, %v713_v54  ;;  %v1260_v58 = vunpack.i.h.bf16 %v1258_v5  ;;  %v1229_v54 = vld [vmem:[%s1671_s5 + $0x10] sm:$0xff] }
 0xb42   :  { %v1308_v57 = vpop.eup %1307  ;;  %v726_v59 = vmul.f32 1.442695, %v721_v56  ;;  %813 = vmatpush.msrb.mxu3 %v1259_v55 }
 0xb43   :  { %v1310_v60 = vpop.eup %1309  ;;  %v732_v61 = vsel %vm156_vm8, %v1308_v57, 0.0 }
 0xb44   :  { %1311 = vpow2.f32 %v726_v59  ;;  %814 = vmatpush.msrb.mxu3 %v1260_v58  ;;  %v741_v62 = vsel %vm156_vm8, %v1310_v60, 0.0  ;;  %733 = vadd.xlane.f32.xlu0 %v732_v61 }
 0xb45   :  { %742 = vadd.xlane.f32.xlu1 %v741_v62 }
 0xb4a   :  { %v1312_v63 = vpop.eup %1311 }
 0xb4b   :  { %v735_v0 = vsel %vm156_vm8, %v1312_v63, 0.0 }
 0xb4c   :  { %736 = vadd.xlane.f32.xlu0 %v735_v0 }
 0xb5e   :  { %1262 = vrot.lane.b32.xlu1 %v1261_v2, %s1362_s1 }
 0xbaf   :  { %v740_v3 = vpop.xlane.xlu0 %739 }
 0xbb0   :  { %1313 = vrcp.f32 %v740_v3 }
 0xbb6   :  { %v1314_v4 = vpop.eup %1313 }
 0xbb7   :  { %v750_v6 = vmul.f32 %v1314_v4, %v1306_v47  ;;  %v734_v11 = vpop.xlane.xlu0 %733 }
 0xbb8   :  { %v743_v7 = vpop.xlane.xlu1 %742 }
 0xbb9   :  { %1315 = vrcp.f32 %v743_v7  ;;  %1178 = vmatmul.msk.f32.vlgmr.msrb.gmra.mxu3 %vm156_vm8, %v750_v6 }
 0xbba   :  { %1317 = vrcp.f32 %v734_v11 }
 0xbbf   :  { %v1316_v8 = vpop.eup %1315  ;;  %v737_v12 = vpop.xlane.xlu0 %736 }
 0xbc0   :  { %v751_v9 = vmul.f32 %v1316_v8, %v1310_v60  ;;  %v1318_v14 = vpop.eup %1317  ;;  %1319 = vrcp.f32 %v737_v12 }
 0xbc1   :  { %v748_v20 = vmul.f32 %v1318_v14, %v1308_v57  ;;  %v912_v14 = vperm.slane %v1561_v19, 4 }
 0xbc2   :  { %1179 = vmatmul.msk.f32.gmra.mxu3 %vm156_vm8, %v751_v9  ;;  %v909_v9 = vperm.slane %v1561_v19, 3 }
 0xbc6   :  { %v1320_v53 = vpop.eup %1319 }
 0xbc7   :  { %v749_v21 = vmul.f32 %v1320_v53, %v1312_v63 }
 0xbd0   :  { %v1263_v13 = vpop.permute.xlu1 %1262 }
 0xbd1   :  { %v1264_v15 = vunpack.i.l.bf16 %v1263_v13  ;;  %v1265_v18 = vunpack.i.h.bf16 %v1263_v13 }
 0xbd3   :  { %778 = vmatpush.msra.mxu2 %v1264_v15 }
 0xbd5   :  { %779 = vmatpush.msra.mxu2 %v1265_v18 }
 0xbd6   :  { %1176 = vmatmul.msk.f32.vlgmr.msra.gmra.mxu2 %vm156_vm8, %v748_v20 }
 0xbd7   :  { %997 = vmatpush.bf16.msrb.mxu2 %v1234_v23 }
 0xbde   :  { %1177 = vmatmul.msk.f32.gmra.mxu2 %vm156_vm8, %v749_v21 }
 0xc3c   :  { %v816_v22 = vpop.f32.mrf.mxu3 }
 0xc45   :  { %v819_v24 = vpop.f32.mrf.mxu3 }
 0xc46   :  { %v1266_v25 = vpack.i.bf16 %v819_v24, %v816_v22  ;;  %v1233_v24 = vld [vmem:[%s1672_s6 + $0x30] sm:$0xff] }
 0xc47   :  { %998 = vmatpush.bf16.msrb.mxu2 %v1233_v24 }
 0xc48   :  { %1267 = vrot.lane.b32.xlu0 %v1266_v25, %s1363_s23  ;;  %v1232_v25 = vld [vmem:[%s1672_s6 + $0x28] sm:$0xff]  ;;  %s1364_s6 = smov [#allocation2]  }
 0xc49   :  { %s1071_s0 = sshll.u32 %s1364_s6, 4  ;;  %s1072_s0 = int_to_ptr.vmem [resolvable:$true] %s1071_s0 }
 0xc4b   :  { %999 = vmatpush.bf16.msrb.mxu2 %v1232_v25 }
 0xc4f   :  { %1000 = vmatpush.bf16.msrb.mxu2 %v1231_v50 }
 0xc59   :  { %v781_v26 = vpop.f32.mrf.mxu2 }
 0xc61   :  { %v784_v29 = vpop.f32.mrf.mxu2 }
 0xcba   :  { %v1268_v27 = vpop.permute.xlu0 %1267 }
 0xcbb   :  { %v1270_v28 = vunpack.i.h.bf16 %v1268_v27  ;;  %v1269_v51 = vunpack.i.l.bf16 %v1268_v27 }
 0xcbd   :  { %v830_v30 = vsel %vm156_vm8, %v781_v26, %v1269_v51  ;;  %v831_v31 = vsel %vm156_vm8, %v784_v29, %v1270_v28  ;;  %v916_v26 = vperm.slane %v1561_v19, 1 }
 0xcbe   :  { %v832_v32 = vpack.c.bf16 %v831_v31, %v830_v30 }
 0xcc0   :  { %1188 = vmatmul.msk.bf16.vlgmr.msrb.gmra.mxu0 %vm34_vm0, %v832_v32 }
 0xd3d   :  { %v858_v34 = vpop.f32.mrf.mxu0 }
 0xd3e   :  { %v859_v35 = vadd.f32 %v858_v34, %v833_v33 }
 0xd40   :  { %v863_v36 = vadd.f32 %v859_v35, %v1551_v16 }
 0xd42   :  { %v865_v37 = vsel %vm34_vm0, %v863_v36, 0.0 }
 0xd43   :  { %866 = vadd.xlane.f32.xlu2 %v865_v37 }
 0xd45   :  { %v860_v38 = vpop.f32.mrf.mxu0 }
 0xd46   :  { %v861_v39 = vadd.f32 %v860_v38, %v833_v33 }
 0xd48   :  { %v864_v40 = vadd.f32 %v861_v39, %v1553_v17  ;;  %v1230_v17 = vld [vmem:[%s1671_s5 + $0x18] sm:$0xff] }
 0xd49   :  { %938 = vmatpush.bf16.msrb.mxu1 %v1230_v17 }
 0xd4a   :  { %v868_v41 = vsel %vm34_vm0, %v864_v40, 0.0 }
 0xd4b   :  { %869 = vadd.xlane.f32.xlu1 %v868_v41 }
 0xd4d   :  { %939 = vmatpush.bf16.msrb.mxu1 %v1229_v54 }
 0xdb6   :  { %v867_v42 = vpop.xlane.xlu2 %866 }
 0xdb7   :  { %v871_v1 = vmul.f32 %v867_v42, %v1418_v10 }
 0xdb9   :  { %v873_v43 = vsub.f32 %v863_v36, %v871_v1 }
 0xdbb   :  { %v875_v44 = vmul.f32 %v873_v43, %v873_v43 }
 0xdbd   :  { %v877_v45 = vsel %vm34_vm0, %v875_v44, 0.0 }
 0xdbe   :  { %v870_v46 = vpop.xlane.xlu1 %869  ;;  %878 = vadd.xlane.f32.xlu0 %v877_v45 }
 0xdbf   :  { %v872_v16 = vmul.f32 %v870_v46, %v1418_v10 }
 0xdc1   :  { %v874_v47 = vsub.f32 %v864_v40, %v872_v16 }
 0xdc3   :  { %v876_v48 = vmul.f32 %v874_v47, %v874_v47 }
 0xdc5   :  { %v880_v49 = vsel %vm34_vm0, %v876_v48, 0.0 }
 0xdc6   :  { %881 = vadd.xlane.f32.xlu2 %v880_v49 }
 0xe31   :  { %v879_v52 = vpop.xlane.xlu0 %878 }
 0xe32   :  { %v883_v5 = vmul.f32 %v879_v52, %v1418_v10 }
 0xe34   :  { %v885_v55 = vadd.f32 1e-12, %v883_v5 }
 0xe36   :  { %1321 = vrsqrt.f32 %v885_v55  ;;  %vm893_vm8 = vweird.f32 %v885_v55 }
 0xe39   :  { %v882_v56 = vpop.xlane.xlu2 %881 }
 0xe3a   :  { %v884_v57 = vmul.f32 %v882_v56, %v1418_v10 }
 0xe3c   :  { %v1322_v58 = vpop.eup %1321  ;;  %v886_v59 = vadd.f32 1e-12, %v884_v57 }
 0xe3d   :  { %v888_v60 = vmul.f32 %v1322_v58, %v885_v55  ;;  %vm894_vm7 = vweird.f32 %v1322_v58 }
 0xe3e   :  { %1323 = vrsqrt.f32 %v886_v59  ;;  %vm895_vm9 = vmor %vm893_vm8, %vm894_vm7  ;;  %vm903_vm11 = vweird.f32 %v886_v59 }
 0xe3f   :  { %v889_v61 = vmul.f32 %v1322_v58, %v888_v60 }
 0xe41   :  { %v890_v62 = vmul.f32 0.5, %v889_v61 }
 0xe43   :  { %v891_v63 = vsub.f32 1.5, %v890_v62 }
 0xe44   :  { %v1324_v0 = vpop.eup %1323 }
 0xe45   :  { %v892_v2 = vmul.f32 %v1322_v58, %v891_v63  ;;  %v898_v3 = vmul.f32 %v1324_v0, %v886_v59  ;;  %vm904_vm10 = vweird.f32 %v1324_v0 }
 0xe46   :  { %vm905_vm12 = vmor %vm903_vm11, %vm904_vm10 }
 0xe47   :  { %v899_v4 = vmul.f32 %v1324_v0, %v898_v3  ;;  %v896_v6 = vsel %vm895_vm9, %v1322_v58, %v892_v2 }
 0xe48   :  { %v907_v11 = vmul.f32 %v896_v6, %v873_v43 }
 0xe49   :  { %v900_v7 = vmul.f32 0.5, %v899_v4 }
 0xe4a   :  { %v910_v15 = vmul.f32 %v909_v9, %v907_v11 }
 0xe4b   :  { %v901_v8 = vsub.f32 1.5, %v900_v7 }
 0xe4c   :  { %v913_v53 = vadd.f32 %v912_v14, %v910_v15 }
 0xe4d   :  { %v902_v12 = vmul.f32 %v1324_v0, %v901_v8 }
 0xe4f   :  { %v906_v13 = vsel %vm905_vm12, %v1324_v0, %v902_v12 }
 0xe50   :  { %v908_v18 = vmul.f32 %v906_v13, %v874_v47  ;;  %v965_v47 = vperm.slane %v1561_v19, 5 }
 0xe52   :  { %v911_v20 = vmul.f32 %v909_v9, %v908_v18 }
 0xe54   :  { %v914_v21 = vadd.f32 %v912_v14, %v911_v20 }
 0xe56   :  { %v915_v22 = vpack.c.bf16 %v914_v21, %v913_v53 }
 0xe58   :  { %1197 = vmatmul.msk.bf16.vlgmr.msrb.gmra.mxu1 %vm34_vm0, %v915_v22 }
 0xed5   :  { %v941_v27 = vpop.f32.mrf.mxu1 }
 0xed6   :  { %v942_v28 = vadd.f32 %v941_v27, %v916_v26 }
 0xed8   :  { %v948_v51 = vmul.f32 0.044715, %v942_v28  ;;  %v946_v1 = vmul.f32 0.5, %v942_v28 }
 0xeda   :  { %v950_v29 = vmul.f32 %v948_v51, %v942_v28 }
 0xedc   :  { %v952_v30 = vmul.f32 %v950_v29, %v942_v28 }
 0xedd   :  { %v943_v31 = vpop.f32.mrf.mxu1 }
 0xede   :  { %v954_v32 = vadd.f32 %v952_v30, %v942_v28  ;;  %v944_v33 = vadd.f32 %v943_v31, %v916_v26  ;;  %v1053_v26 = vperm.slane %v1561_v19, 6  ;;  %v1056_v30 = vperm.slane %v1561_v19, 7 }
 0xee0   :  { %v949_v34 = vmul.f32 0.044715, %v944_v33  ;;  %v956_v35 = vmul.f32 0.7978846, %v954_v32  ;;  %v947_v43 = vmul.f32 0.5, %v944_v33 }
 0xee2   :  { %v951_v36 = vmul.f32 %v949_v34, %v944_v33  ;;  %1325 = vtanh.f32 %v956_v35 }
 0xee4   :  { %v953_v37 = vmul.f32 %v951_v36, %v944_v33 }
 0xee6   :  { %v955_v38 = vadd.f32 %v953_v37, %v944_v33 }
 0xee8   :  { %v957_v39 = vmul.f32 0.7978846, %v955_v38  ;;  %v1326_v40 = vpop.eup %1325 }
 0xee9   :  { %v960_v41 = vadd.f32 1.0, %v1326_v40 }
 0xeea   :  { %1327 = vtanh.f32 %v957_v39 }
 0xeeb   :  { %v962_v45 = vmul.f32 %v960_v41, %v946_v1 }
 0xef0   :  { %v1328_v42 = vpop.eup %1327 }
 0xef1   :  { %v961_v44 = vadd.f32 1.0, %v1328_v42 }
 0xef3   :  { %v963_v46 = vmul.f32 %v961_v44, %v947_v43 }
 0xef5   :  { %v964_v16 = vpack.c.bf16 %v963_v46, %v962_v45 }
 0xef7   :  { %1214 = vmatmul.msk.bf16.vlgmr.msrb.gmra.mxu2 %vm505_vm15, %v964_v16 }
 0xf7a   :  { %v1002_v48 = vpop.f32.mrf.mxu2 }
 0xf7b   :  { %v1003_v49 = vadd.f32 %v1002_v48, %v965_v47 }
 0xf7d   :  { %v1007_v17 = vadd.f32 %v1003_v49, %v913_v53 }
 0xf7f   :  { %v1009_v52 = vsel %vm34_vm0, %v1007_v17, 0.0 }
 0xf80   :  { %1010 = vadd.xlane.f32.xlu1 %v1009_v52 }
 0xf82   :  { %v1004_v5 = vpop.f32.mrf.mxu2 }
 0xf83   :  { %v1005_v54 = vadd.f32 %v1004_v5, %v965_v47 }
 0xf85   :  { %v1008_v55 = vadd.f32 %v1005_v54, %v914_v21 }
 0xf87   :  { %v1012_v56 = vsel %vm34_vm0, %v1008_v55, 0.0 }
 0xf88   :  { %1013 = vadd.xlane.f32.xlu2 %v1012_v56 }
 0xff3   :  { %v1011_v57 = vpop.xlane.xlu1 %1010 }
 0xff4   :  { %v1015_v58 = vmul.f32 %v1011_v57, %v1418_v10 }
 0xff6   :  { %v1017_v59 = vsub.f32 %v1007_v17, %v1015_v58 }
 0xff8   :  { %v1019_v60 = vmul.f32 %v1017_v59, %v1017_v59 }
 0xffa   :  { %v1021_v61 = vsel %vm34_vm0, %v1019_v60, 0.0 }
 0xffb   :  { %v1014_v62 = vpop.xlane.xlu2 %1013  ;;  %1022 = vadd.xlane.f32.xlu0 %v1021_v61 }
 0xffc   :  { %v1016_v63 = vmul.f32 %v1014_v62, %v1418_v10 }
 0xffe   :  { %v1018_v0 = vsub.f32 %v1008_v55, %v1016_v63 }
0x1000   :  { %v1020_v2 = vmul.f32 %v1018_v0, %v1018_v0 }
0x1002   :  { %v1024_v3 = vsel %vm34_vm0, %v1020_v2, 0.0 }
0x1003   :  { %1025 = vadd.xlane.f32.xlu2 %v1024_v3 }
0x106e   :  { %v1023_v4 = vpop.xlane.xlu0 %1022 }
0x106f   :  { %v1027_v6 = vmul.f32 %v1023_v4, %v1418_v10 }
0x1071   :  { %v1029_v7 = vadd.f32 1e-12, %v1027_v6 }
0x1073   :  { %1329 = vrsqrt.f32 %v1029_v7  ;;  %vm1037_vm13 = vweird.f32 %v1029_v7 }
0x1076   :  { %v1026_v8 = vpop.xlane.xlu2 %1025 }
0x1077   :  { %v1028_v9 = vmul.f32 %v1026_v8, %v1418_v10 }
0x1079   :  { %v1330_v11 = vpop.eup %1329  ;;  %v1030_v12 = vadd.f32 1e-12, %v1028_v9 }
0x107a   :  { %v1032_v13 = vmul.f32 %v1330_v11, %v1029_v7  ;;  %vm1038_vm0 = vweird.f32 %v1330_v11 }
0x107b   :  { %1331 = vrsqrt.f32 %v1030_v12  ;;  %vm1039_vm14 = vmor %vm1037_vm13, %vm1038_vm0  ;;  %vm1047_vm1 = vweird.f32 %v1030_v12 }
0x107c   :  { %v1033_v14 = vmul.f32 %v1330_v11, %v1032_v13 }
0x107e   :  { %v1034_v15 = vmul.f32 0.5, %v1033_v14 }
0x1080   :  { %v1035_v18 = vsub.f32 1.5, %v1034_v15 }
0x1081   :  { %v1332_v20 = vpop.eup %1331 }
0x1082   :  { %v1042_v53 = vmul.f32 %v1332_v20, %v1030_v12  ;;  %v1036_v21 = vmul.f32 %v1330_v11, %v1035_v18  ;;  %vm1048_vm15 = vweird.f32 %v1332_v20 }
0x1083   :  { %vm1049_vm2 = vmor %vm1047_vm1, %vm1048_vm15 }
0x1084   :  { %v1043_v22 = vmul.f32 %v1332_v20, %v1042_v53  ;;  %v1040_v24 = vsel %vm1039_vm14, %v1330_v11, %v1036_v21 }
0x1085   :  { %v1051_v10 = vmul.f32 %v1040_v24, %v1017_v59 }
0x1086   :  { %v1044_v23 = vmul.f32 0.5, %v1043_v22 }
0x1087   :  { %v1054_v51 = vmul.f32 %v1053_v26, %v1051_v10 }
0x1088   :  { %v1045_v25 = vsub.f32 1.5, %v1044_v23 }
0x1089   :  { %v1057_v32 = vadd.f32 %v1056_v30, %v1054_v51 }
0x108a   :  { %v1046_v50 = vmul.f32 %v1332_v20, %v1045_v25 }
0x108c   :  { %v1050_v27 = vsel %vm1049_vm2, %v1332_v20, %v1046_v50 }
0x108d   :  { %v1052_v28 = vmul.f32 %v1050_v27, %v1018_v0 }
0x108f   :  { %v1055_v29 = vmul.f32 %v1053_v26, %v1052_v28 }
0x1091   :  { %v1058_v31 = vadd.f32 %v1056_v30, %v1055_v29 }
0x1093   :  { %v1060_v33 = vrot.slane %v1058_v31, 7 }
0x1095   :  { %v1063_v34 = vsel %vm1062_vm3, %v1057_v32, %v1060_v33 }
0x1096   :  { %1065 = vst.msk [vmem:[#allocation2] sm:$0x3] %vm1064_vm4, %v1063_v34 }
0x1097   :  { %1076 = dma.vmem_to_hbm [thread:$0]  %s1072_s0, 32, %s1074_s11, [#allocation3]  }
0x1098   :  { %1357 = dma.done.wait [#allocation3], 32  }
0x1099   :  { %1358 = vsyncadd [#allocation3], 4294967264 }
0x109a   :  { %1081 = vsyncpa [#allocation3], 1 }

</bundles_post_ra>
